<compile_context>
chip_gen: v5e
topology: v5e:2x2
jax: 0.10.0
libtpu: 0.0.40
codegen_flags: <defaults>
</compile_context>

<pallas_src>
import jax
import jax.numpy as jnp
from jax import lax
from jax.experimental import pallas as pl
from jax.experimental.pallas import tpu as pltpu


CP = 8   # channel padding (one sublane tile); both conv in/out channels <= CP


def _shift_flat(x, s):
    """y[:, n] = x[:, n + s], zero-filled outside [0, N).  s is static."""
    if s == 0:
        return x
    rows, _ = x.shape
    if s > 0:
        return jnp.concatenate(
            [x[:, s:], jnp.zeros((rows, s), x.dtype)], axis=1)
    return jnp.concatenate(
        [jnp.zeros((rows, -s), x.dtype), x[:, :s]], axis=1)


def _make_node_kernel(C, H, W):
    HW = H * W

    def node_kernel(t_ref, u0_ref, w1_ref, b1_ref, w2_ref, b2_ref,
                    out_ref, u_s):
        """Grid = (batch, time).  One invocation = one (b, t) node.

        t_ref   : (T,)        f32, SMEM time grid
        u0_ref  : (CP, HW)    initial state of this batch (channels padded)
        w1_ref  : (CP, 9*CP)  conv1 im2col weights   b1_ref: (CP, 1)
        w2_ref  : (CP, 9*CP)  conv2 im2col weights   b2_ref: (CP, 1)
        out_ref : (C, HW)     solution slab at (b, t)
        u_s     : (CP, HW)    VMEM ODE state, persists across the time axis
        """
        i = pl.program_id(1)
        num_t = pl.num_programs(1)

        # Column-validity masks for the x-direction taps (the y-direction
        # zero padding falls out of the zero fill in _shift_flat).
        col = lax.broadcasted_iota(jnp.int32, (1, HW), 1)
        xpos = col % W
        xm_left = (xpos != 0).astype(jnp.float32)       # x-1 tap valid
        xm_right = (xpos != W - 1).astype(jnp.float32)  # x+1 tap valid

        def conv3x3(x, w_ref, b_ref):
            # im2col: 9 in-register shifted/masked copies stacked on sublanes,
            # then a single MXU matmul with K = 9*CP, lane-dense N = HW.
            taps = []
            for dy in range(3):
                for dx in range(3):
                    tv = _shift_flat(x, (dy - 1) * W + (dx - 1))
                    if dx == 0:
                        tv = tv * xm_left
                    elif dx == 2:
                        tv = tv * xm_right
                    taps.append(tv)
            patch = jnp.concatenate(taps, axis=0)               # (9*CP, HW)
            out = jnp.dot(w_ref[...], patch,
                          preferred_element_type=jnp.float32)   # (CP, HW)
            return out + b_ref[...]                             # bias once

        def f(u):
            # convnet(t, u): t is ignored by the CNN (standard cnn_node RHS).
            h = jnp.tanh(conv3x3(u, w1_ref, b1_ref))
            return conv3x3(h, w2_ref, b2_ref)

        @pl.when(i == 0)
        def _init():
            u_s[...] = u0_ref[...]

        # odeint returns the state at every t node, including t[0] == u0.
        out_ref[...] = u_s[...][:C, :]

        @pl.when(i < num_t - 1)
        def _step():
            dt = t_ref[i + 1] - t_ref[i]
            u = u_s[...]
            k1 = f(u)
            k2 = f(u + 0.5 * dt * k1)
            k3 = f(u + 0.5 * dt * k2)
            k4 = f(u + dt * k3)
            u_s[...] = u + (dt / 6.0) * (k1 + 2.0 * k2 + 2.0 * k3 + k4)

    return node_kernel


def _pack_conv(w, b, cp_in, cp_out):
    """HWIO (3,3,Cin,Cout) weights + (1,Cout) bias -> im2col matrices.

    Returns w_mat (cp_out, 9*cp_in) with w_mat[co, (dy*3+dx)*cp_in + ci] =
    w[dy, dx, ci, co] (zero in padded rows/cols) and bias column (cp_out, 1).
    """
    kh, kw, cin, cout = w.shape
    w_r = jnp.transpose(w, (3, 0, 1, 2))                       # (Cout,3,3,Cin)
    w_r = jnp.pad(w_r, ((0, cp_out - cout), (0, 0), (0, 0), (0, cp_in - cin)))
    w_mat = w_r.reshape(cp_out, kh * kw * cp_in).astype(jnp.float32)
    b_col = jnp.pad(b.reshape(-1), (0, cp_out - cout)).reshape(cp_out, 1)
    return w_mat, b_col.astype(jnp.float32)


def neural_ode_forward(t, x_nchw, params):
    """t: (T,) f32; x_nchw: (B, C, H, W) f32. Returns (B, T, C, H, W)."""
    w1, b1, w2, b2 = params
    B, C, H, W = x_nchw.shape
    CH = w1.shape[-1]
    T = t.shape[0]
    HW = H * W
    assert C <= CP and CH <= CP, "channel counts must fit the CP=8 sublane pad"

    w1p, b1p = _pack_conv(w1, b1, CP, CP)
    w2p, b2p = _pack_conv(w2, b2, CP, CP)

    # (B, C, H, W) -> (B, CP, H*W): channels on sublanes (zero-padded rows),
    # flat spatial on lanes (lane-dense).
    u0p = jnp.pad(x_nchw.astype(jnp.float32).reshape(B, C, HW),
                  ((0, 0), (0, CP - C), (0, 0)))

    out = pl.pallas_call(
        _make_node_kernel(C, H, W),
        out_shape=jax.ShapeDtypeStruct((B, T, C, HW), jnp.float32),
        grid_spec=pltpu.PrefetchScalarGridSpec(
            num_scalar_prefetch=0,
            grid=(B, T),
            in_specs=[
                pl.BlockSpec(memory_space=pltpu.MemorySpace.SMEM),      # t
                pl.BlockSpec((None, CP, HW), lambda b, i: (b, 0, 0)),   # u0
                pl.BlockSpec((CP, 9 * CP), lambda b, i: (0, 0)),        # w1
                pl.BlockSpec((CP, 1), lambda b, i: (0, 0)),             # b1
                pl.BlockSpec((CP, 9 * CP), lambda b, i: (0, 0)),        # w2
                pl.BlockSpec((CP, 1), lambda b, i: (0, 0)),             # b2
            ],
            out_specs=pl.BlockSpec((None, None, C, HW),
                                   lambda b, i: (b, i, 0, 0)),
            scratch_shapes=[
                pltpu.VMEM((CP, HW), jnp.float32),   # ODE state (per core)
            ],
        ),
        compiler_params=pltpu.CompilerParams(
            # batch across TensorCores (v7x megacore); time is sequential.
            dimension_semantics=("parallel", "arbitrary")),
    )(t.astype(jnp.float32), u0p, w1p, b1p, w2p, b2p)

    # (B, T, C, H*W) -> (B, T, C, H, W) == odeint(...).permute(1,0,2,3,4)
    return out.reshape(B, T, C, H, W)


# ---------------- pure-JAX reference (for correctness check) ----------------
def _conv3x3_ref(x, w, b):
    y = lax.conv_general_dilated(x, w, window_strides=(1, 1), padding="SAME",
                                 dimension_numbers=("NHWC", "HWIO", "NHWC"))
    return y + b.reshape(1, 1, 1, -1)


def _ref_forward(t, x_nchw, params):
    w1, b1, w2, b2 = params
    u0 = jnp.transpose(x_nchw, (0, 2, 3, 1)).astype(jnp.float32)

    def f(u):
        return _conv3x3_ref(jnp.tanh(_conv3x3_ref(u, w1, b1)), w2, b2)

    def step(u, i):
        dt = t[i + 1] - t[i]
        k1 = f(u)
        k2 = f(u + 0.5 * dt * k1)
        k3 = f(u + 0.5 * dt * k2)
        k4 = f(u + dt * k3)
        un = u + (dt / 6.0) * (k1 + 2.0 * k2 + 2.0 * k3 + k4)
        return un, un

    _, rest = lax.scan(step, u0, jnp.arange(t.shape[0] - 1))
    u_all = jnp.concatenate([u0[None], rest], axis=0)        # (T, B, H, W, C)
    return jnp.transpose(u_all, (1, 0, 4, 2, 3))             # (B, T, C, H, W)


if __name__ == "__main__":
    B, C, H, W = 2, 4, 16, 16
    CH = 8          # hidden channels of the convnet RHS
    T = 8           # time nodes

    key = jax.random.PRNGKey(0)
    kx, kw1, kb1, kw2, kb2 = jax.random.split(key, 5)

    x = jax.random.normal(kx, (B, C, H, W), jnp.float32)
    t = jnp.linspace(0.0, 1.0, T, dtype=jnp.float32)

    # Deterministic synthetic parameters (HWIO layout), scaled for stability.
    w1 = 0.1 * jax.random.normal(kw1, (3, 3, C, CH), jnp.float32)
    b1 = 0.1 * jax.random.normal(kb1, (1, CH), jnp.float32)
    w2 = 0.1 * jax.random.normal(kw2, (3, 3, CH, C), jnp.float32)
    b2 = 0.1 * jax.random.normal(kb2, (1, C), jnp.float32)
    params = (w1, b1, w2, b2)

    out = jax.block_until_ready(neural_ode_forward(t, x, params))
    ref = jax.block_until_ready(_ref_forward(t, x, params))

    assert out.shape == (B, T, C, H, W), out.shape
    assert jnp.allclose(out, ref, atol=2e-3, rtol=2e-3), (
        float(jnp.max(jnp.abs(out - ref))))

    print("KERNEL_OK")
</pallas_src>

<mosaic_0001>
module attributes {stable_mosaic.version = 11 : i64} {
  func.func @node_kernel(%arg0: i32, %arg1: i32, %arg2: memref<8xf32, #tpu.memory_space<smem>>, %arg3: memref<1x8x256xf32, #tpu.memory_space<vmem>>, %arg4: memref<8x72xf32, #tpu.memory_space<vmem>>, %arg5: memref<8x1xf32, #tpu.memory_space<vmem>>, %arg6: memref<8x72xf32, #tpu.memory_space<vmem>>, %arg7: memref<8x1xf32, #tpu.memory_space<vmem>>, %arg8: memref<1x1x4x256xf32, #tpu.memory_space<vmem>>, %arg9: memref<8x256xf32, #tpu.memory_space<vmem>>) attributes {dimension_semantics = [#tpu.dimension_semantics<parallel>, #tpu.dimension_semantics<arbitrary>], iteration_bounds = array<i64: 2, 8>, scalar_prefetch = 0 : i64, scratch_operands = 1 : i64, tpu.core_type = #tpu.core_type<tc>, window_params = [{transform_indices = @transform_0, window_bounds = array<i64: 8>}, {transform_indices = @transform_1, window_bounds = array<i64: 1, 8, 256>}, {pipeline_mode = #tpu.pipeline_mode<synchronous>, transform_indices = @transform_2, window_bounds = array<i64: 8, 72>}, {pipeline_mode = #tpu.pipeline_mode<synchronous>, transform_indices = @transform_3, window_bounds = array<i64: 8, 1>}, {pipeline_mode = #tpu.pipeline_mode<synchronous>, transform_indices = @transform_4, window_bounds = array<i64: 8, 72>}, {pipeline_mode = #tpu.pipeline_mode<synchronous>, transform_indices = @transform_5, window_bounds = array<i64: 8, 1>}, {transform_indices = @transform_6, window_bounds = array<i64: 1, 1, 4, 256>}]} {
    %0 = tpu.iota {dimensions = array<i32: 1>} : vector<1x256xi32>
    %c16_i32 = arith.constant 16 : i32
    %c0_i32 = arith.constant 0 : i32
    %1 = arith.cmpi eq, %c16_i32, %c0_i32 : i32
    %c1_i32 = arith.constant 1 : i32
    %2 = arith.select %1, %c1_i32, %c16_i32 : i32
    %3 = vector.broadcast %2 : i32 to vector<1x256xi32>
    %4 = arith.remsi %0, %3 : vector<1x256xi32>
    %c0_i32_0 = arith.constant 0 : i32
    %5 = vector.broadcast %c0_i32_0 : i32 to vector<1x256xi32>
    %6 = arith.cmpi ne, %4, %5 : vector<1x256xi32>
    %c0_i32_1 = arith.constant 0 : i32
    %7 = vector.broadcast %c0_i32_1 : i32 to vector<1x256xi32>
    %8 = arith.cmpi slt, %4, %7 : vector<1x256xi32>
    %c0_i32_2 = arith.constant 0 : i32
    %9 = arith.cmpi slt, %2, %c0_i32_2 : i32
    %10 = vector.broadcast %9 : i1 to vector<1x256xi1>
    %11 = vector.broadcast %10 : vector<1x256xi1> to vector<1x256xi1>
    %12 = arith.xori %8, %11 : vector<1x256xi1>
    %13 = arith.andi %12, %6 : vector<1x256xi1>
    %14 = vector.broadcast %2 : i32 to vector<1x256xi32>
    %15 = arith.addi %4, %14 : vector<1x256xi32>
    %16 = arith.select %13, %15, %4 : vector<1x256xi1>, vector<1x256xi32>
    %c0_i32_3 = arith.constant 0 : i32
    %17 = vector.broadcast %c0_i32_3 : i32 to vector<1x256xi32>
    %18 = arith.cmpi ne, %16, %17 : vector<1x256xi32>
    %19 = arith.extui %18 : vector<1x256xi1> to vector<1x256xi32>
    %20 = arith.sitofp %19 : vector<1x256xi32> to vector<1x256xf32>
    %c15_i32 = arith.constant 15 : i32
    %21 = vector.broadcast %c15_i32 : i32 to vector<1x256xi32>
    %22 = arith.cmpi ne, %16, %21 : vector<1x256xi32>
    %23 = arith.extui %22 : vector<1x256xi1> to vector<1x256xi32>
    %24 = arith.sitofp %23 : vector<1x256xi32> to vector<1x256xf32>
    %c0_i32_4 = arith.constant 0 : i32
    %25 = arith.cmpi eq, %arg1, %c0_i32_4 : i32
    %26 = arith.extui %25 : i1 to i32
    %c0_i32_5 = arith.constant 0 : i32
    %27 = arith.cmpi ne, %26, %c0_i32_5 : i32
    scf.if %27 {
      %c0_12 = arith.constant 0 : index
      %c0_13 = arith.constant 0 : index
      %c0_14 = arith.constant 0 : index
      %36 = vector.load %arg3[%c0_12, %c0_13, %c0_14] : memref<1x8x256xf32, #tpu.memory_space<vmem>>, vector<1x8x256xf32>
      %37 = vector.shape_cast %36 : vector<1x8x256xf32> to vector<8x256xf32>
      %c0_15 = arith.constant 0 : index
      %c0_16 = arith.constant 0 : index
      %38 = vector.load %arg9[%c0_15, %c0_16] : memref<8x256xf32, #tpu.memory_space<vmem>>, vector<8x256xf32>
      tpu.vector_store %arg9[%c0_15, %c0_16], %37 {strides = array<i32>} : memref<8x256xf32, #tpu.memory_space<vmem>>, vector<8x256xf32>,
    } else {
    }
    %c0 = arith.constant 0 : index
    %c0_6 = arith.constant 0 : index
    %28 = vector.load %arg9[%c0, %c0_6] : memref<8x256xf32, #tpu.memory_space<vmem>>, vector<8x256xf32>
    %29 = vector.extract_strided_slice %28 {offsets = [0, 0], sizes = [4, 256], strides = [1, 1]} : vector<8x256xf32> to vector<4x256xf32>
    %c0_7 = arith.constant 0 : index
    %c0_8 = arith.constant 0 : index
    %c0_9 = arith.constant 0 : index
    %c0_10 = arith.constant 0 : index
    %30 = vector.load %arg8[%c0_7, %c0_8, %c0_9, %c0_10] : memref<1x1x4x256xf32, #tpu.memory_space<vmem>>, vector<1x1x4x256xf32>
    %31 = vector.shape_cast %30 : vector<1x1x4x256xf32> to vector<4x256xf32>
    %32 = vector.shape_cast %29 : vector<4x256xf32> to vector<1x1x4x256xf32>
    tpu.vector_store %arg8[%c0_7, %c0_8, %c0_9, %c0_10], %32 {strides = array<i32>} : memref<1x1x4x256xf32, #tpu.memory_space<vmem>>, vector<1x1x4x256xf32>,
    %c7_i32 = arith.constant 7 : i32
    %33 = arith.cmpi slt, %arg1, %c7_i32 : i32
    %34 = arith.extui %33 : i1 to i32
    %c0_i32_11 = arith.constant 0 : i32
    %35 = arith.cmpi ne, %34, %c0_i32_11 : i32
    scf.if %35 {
      %c1_i32_12 = arith.constant 1 : i32
      %36 = arith.addi %arg1, %c1_i32_12 : i32
      %37 = arith.index_cast %36 : i32 to index
      %38 = memref.load %arg2[%37] : memref<8xf32, #tpu.memory_space<smem>>
      %39 = arith.index_cast %arg1 : i32 to index
      %40 = memref.load %arg2[%39] : memref<8xf32, #tpu.memory_space<smem>>
      %41 = arith.subf %38, %40 : f32
      %c0_13 = arith.constant 0 : index
      %c0_14 = arith.constant 0 : index
      %42 = vector.load %arg9[%c0_13, %c0_14] : memref<8x256xf32, #tpu.memory_space<vmem>>, vector<8x256xf32>
      %cst = arith.constant 0.000000e+00 : f32
      %43 = vector.broadcast %cst : f32 to vector<8x17xf32>
      %44 = vector.extract_strided_slice %42 {offsets = [0, 0], sizes = [8, 239], strides = [1, 1]} : vector<8x256xf32> to vector<8x239xf32>
      %45 = tpu.concatenate %43, %44 in 1 : vector<8x17xf32>, vector<8x239xf32> -> vector<8x256xf32>
      %46 = vector.broadcast %20 : vector<1x256xf32> to vector<8x256xf32>
      %47 = arith.mulf %45, %46 : vector<8x256xf32>
      %cst_15 = arith.constant 0.000000e+00 : f32
      %48 = vector.broadcast %cst_15 : f32 to vector<8x16xf32>
      %49 = vector.extract_strided_slice %42 {offsets = [0, 0], sizes = [8, 240], strides = [1, 1]} : vector<8x256xf32> to vector<8x240xf32>
      %50 = tpu.concatenate %48, %49 in 1 : vector<8x16xf32>, vector<8x240xf32> -> vector<8x256xf32>
      %cst_16 = arith.constant 0.000000e+00 : f32
      %51 = vector.broadcast %cst_16 : f32 to vector<8x15xf32>
      %52 = vector.extract_strided_slice %42 {offsets = [0, 0], sizes = [8, 241], strides = [1, 1]} : vector<8x256xf32> to vector<8x241xf32>
      %53 = tpu.concatenate %51, %52 in 1 : vector<8x15xf32>, vector<8x241xf32> -> vector<8x256xf32>
      %54 = vector.broadcast %24 : vector<1x256xf32> to vector<8x256xf32>
      %55 = arith.mulf %53, %54 : vector<8x256xf32>
      %cst_17 = arith.constant 0.000000e+00 : f32
      %56 = vector.broadcast %cst_17 : f32 to vector<8x1xf32>
      %57 = vector.extract_strided_slice %42 {offsets = [0, 0], sizes = [8, 255], strides = [1, 1]} : vector<8x256xf32> to vector<8x255xf32>
      %58 = tpu.concatenate %56, %57 in 1 : vector<8x1xf32>, vector<8x255xf32> -> vector<8x256xf32>
      %59 = vector.broadcast %20 : vector<1x256xf32> to vector<8x256xf32>
      %60 = arith.mulf %58, %59 : vector<8x256xf32>
      %61 = vector.extract_strided_slice %42 {offsets = [0, 1], sizes = [8, 255], strides = [1, 1]} : vector<8x256xf32> to vector<8x255xf32>
      %cst_18 = arith.constant 0.000000e+00 : f32
      %62 = vector.broadcast %cst_18 : f32 to vector<8x1xf32>
      %63 = tpu.concatenate %61, %62 in 1 : vector<8x255xf32>, vector<8x1xf32> -> vector<8x256xf32>
      %64 = vector.broadcast %24 : vector<1x256xf32> to vector<8x256xf32>
      %65 = arith.mulf %63, %64 : vector<8x256xf32>
      %66 = vector.extract_strided_slice %42 {offsets = [0, 15], sizes = [8, 241], strides = [1, 1]} : vector<8x256xf32> to vector<8x241xf32>
      %cst_19 = arith.constant 0.000000e+00 : f32
      %67 = vector.broadcast %cst_19 : f32 to vector<8x15xf32>
      %68 = tpu.concatenate %66, %67 in 1 : vector<8x241xf32>, vector<8x15xf32> -> vector<8x256xf32>
      %69 = vector.broadcast %20 : vector<1x256xf32> to vector<8x256xf32>
      %70 = arith.mulf %68, %69 : vector<8x256xf32>
      %71 = vector.extract_strided_slice %42 {offsets = [0, 16], sizes = [8, 240], strides = [1, 1]} : vector<8x256xf32> to vector<8x240xf32>
      %cst_20 = arith.constant 0.000000e+00 : f32
      %72 = vector.broadcast %cst_20 : f32 to vector<8x16xf32>
      %73 = tpu.concatenate %71, %72 in 1 : vector<8x240xf32>, vector<8x16xf32> -> vector<8x256xf32>
      %74 = vector.extract_strided_slice %42 {offsets = [0, 17], sizes = [8, 239], strides = [1, 1]} : vector<8x256xf32> to vector<8x239xf32>
      %cst_21 = arith.constant 0.000000e+00 : f32
      %75 = vector.broadcast %cst_21 : f32 to vector<8x17xf32>
      %76 = tpu.concatenate %74, %75 in 1 : vector<8x239xf32>, vector<8x17xf32> -> vector<8x256xf32>
      %77 = vector.broadcast %24 : vector<1x256xf32> to vector<8x256xf32>
      %78 = arith.mulf %76, %77 : vector<8x256xf32>
      %79 = tpu.concatenate %47, %50, %55, %60, %42, %65, %70, %73, %78 in 0 : vector<8x256xf32>, vector<8x256xf32>, vector<8x256xf32>, vector<8x256xf32>, vector<8x256xf32>, vector<8x256xf32>, vector<8x256xf32>, vector<8x256xf32>, vector<8x256xf32> -> vector<72x256xf32>
      %c0_22 = arith.constant 0 : index
      %c0_23 = arith.constant 0 : index
      %80 = vector.load %arg4[%c0_22, %c0_23] : memref<8x72xf32, #tpu.memory_space<vmem>>, vector<8x72xf32>
      %cst_24 = arith.constant dense<0.000000e+00> : vector<8x256xf32>
      %81 = tpu.matmul %80, %79, %cst_24 {dimension_numbers = #tpu.dot_dimension_numbers<[1], [0], [0], [1], [0, 0, 1, 1], [], []>} : vector<8x72xf32>, vector<72x256xf32>, vector<8x256xf32> -> vector<8x256xf32>
      %c0_25 = arith.constant 0 : index
      %c0_26 = arith.constant 0 : index
      %82 = vector.load %arg5[%c0_25, %c0_26] : memref<8x1xf32, #tpu.memory_space<vmem>>, vector<8x1xf32>
      %83 = vector.broadcast %82 : vector<8x1xf32> to vector<8x256xf32>
      %84 = arith.addf %81, %83 : vector<8x256xf32>
      %85 = math.tanh %84 : vector<8x256xf32>
      %cst_27 = arith.constant 0.000000e+00 : f32
      %86 = vector.broadcast %cst_27 : f32 to vector<8x17xf32>
      %87 = vector.extract_strided_slice %85 {offsets = [0, 0], sizes = [8, 239], strides = [1, 1]} : vector<8x256xf32> to vector<8x239xf32>
      %88 = tpu.concatenate %86, %87 in 1 : vector<8x17xf32>, vector<8x239xf32> -> vector<8x256xf32>
      %89 = vector.broadcast %20 : vector<1x256xf32> to vector<8x256xf32>
      %90 = arith.mulf %88, %89 : vector<8x256xf32>
      %cst_28 = arith.constant 0.000000e+00 : f32
      %91 = vector.broadcast %cst_28 : f32 to vector<8x16xf32>
      %92 = vector.extract_strided_slice %85 {offsets = [0, 0], sizes = [8, 240], strides = [1, 1]} : vector<8x256xf32> to vector<8x240xf32>
      %93 = tpu.concatenate %91, %92 in 1 : vector<8x16xf32>, vector<8x240xf32> -> vector<8x256xf32>
      %cst_29 = arith.constant 0.000000e+00 : f32
      %94 = vector.broadcast %cst_29 : f32 to vector<8x15xf32>
      %95 = vector.extract_strided_slice %85 {offsets = [0, 0], sizes = [8, 241], strides = [1, 1]} : vector<8x256xf32> to vector<8x241xf32>
      %96 = tpu.concatenate %94, %95 in 1 : vector<8x15xf32>, vector<8x241xf32> -> vector<8x256xf32>
      %97 = vector.broadcast %24 : vector<1x256xf32> to vector<8x256xf32>
      %98 = arith.mulf %96, %97 : vector<8x256xf32>
      %cst_30 = arith.constant 0.000000e+00 : f32
      %99 = vector.broadcast %cst_30 : f32 to vector<8x1xf32>
      %100 = vector.extract_strided_slice %85 {offsets = [0, 0], sizes = [8, 255], strides = [1, 1]} : vector<8x256xf32> to vector<8x255xf32>
      %101 = tpu.concatenate %99, %100 in 1 : vector<8x1xf32>, vector<8x255xf32> -> vector<8x256xf32>
      %102 = vector.broadcast %20 : vector<1x256xf32> to vector<8x256xf32>
      %103 = arith.mulf %101, %102 : vector<8x256xf32>
      %104 = vector.extract_strided_slice %85 {offsets = [0, 1], sizes = [8, 255], strides = [1, 1]} : vector<8x256xf32> to vector<8x255xf32>
      %cst_31 = arith.constant 0.000000e+00 : f32
      %105 = vector.broadcast %cst_31 : f32 to vector<8x1xf32>
      %106 = tpu.concatenate %104, %105 in 1 : vector<8x255xf32>, vector<8x1xf32> -> vector<8x256xf32>
      %107 = vector.broadcast %24 : vector<1x256xf32> to vector<8x256xf32>
      %108 = arith.mulf %106, %107 : vector<8x256xf32>
      %109 = vector.extract_strided_slice %85 {offsets = [0, 15], sizes = [8, 241], strides = [1, 1]} : vector<8x256xf32> to vector<8x241xf32>
      %cst_32 = arith.constant 0.000000e+00 : f32
      %110 = vector.broadcast %cst_32 : f32 to vector<8x15xf32>
      %111 = tpu.concatenate %109, %110 in 1 : vector<8x241xf32>, vector<8x15xf32> -> vector<8x256xf32>
      %112 = vector.broadcast %20 : vector<1x256xf32> to vector<8x256xf32>
      %113 = arith.mulf %111, %112 : vector<8x256xf32>
      %114 = vector.extract_strided_slice %85 {offsets = [0, 16], sizes = [8, 240], strides = [1, 1]} : vector<8x256xf32> to vector<8x240xf32>
      %cst_33 = arith.constant 0.000000e+00 : f32
      %115 = vector.broadcast %cst_33 : f32 to vector<8x16xf32>
      %116 = tpu.concatenate %114, %115 in 1 : vector<8x240xf32>, vector<8x16xf32> -> vector<8x256xf32>
      %117 = vector.extract_strided_slice %85 {offsets = [0, 17], sizes = [8, 239], strides = [1, 1]} : vector<8x256xf32> to vector<8x239xf32>
      %cst_34 = arith.constant 0.000000e+00 : f32
      %118 = vector.broadcast %cst_34 : f32 to vector<8x17xf32>
      %119 = tpu.concatenate %117, %118 in 1 : vector<8x239xf32>, vector<8x17xf32> -> vector<8x256xf32>
      %120 = vector.broadcast %24 : vector<1x256xf32> to vector<8x256xf32>
      %121 = arith.mulf %119, %120 : vector<8x256xf32>
      %122 = tpu.concatenate %90, %93, %98, %103, %85, %108, %113, %116, %121 in 0 : vector<8x256xf32>, vector<8x256xf32>, vector<8x256xf32>, vector<8x256xf32>, vector<8x256xf32>, vector<8x256xf32>, vector<8x256xf32>, vector<8x256xf32>, vector<8x256xf32> -> vector<72x256xf32>
      %c0_35 = arith.constant 0 : index
      %c0_36 = arith.constant 0 : index
      %123 = vector.load %arg6[%c0_35, %c0_36] : memref<8x72xf32, #tpu.memory_space<vmem>>, vector<8x72xf32>
      %cst_37 = arith.constant dense<0.000000e+00> : vector<8x256xf32>
      %124 = tpu.matmul %123, %122, %cst_37 {dimension_numbers = #tpu.dot_dimension_numbers<[1], [0], [0], [1], [0, 0, 1, 1], [], []>} : vector<8x72xf32>, vector<72x256xf32>, vector<8x256xf32> -> vector<8x256xf32>
      %c0_38 = arith.constant 0 : index
      %c0_39 = arith.constant 0 : index
      %125 = vector.load %arg7[%c0_38, %c0_39] : memref<8x1xf32, #tpu.memory_space<vmem>>, vector<8x1xf32>
      %126 = vector.broadcast %125 : vector<8x1xf32> to vector<8x256xf32>
      %127 = arith.addf %124, %126 : vector<8x256xf32>
      %cst_40 = arith.constant 5.000000e-01 : f32
      %128 = arith.mulf %cst_40, %41 : f32
      %129 = vector.broadcast %128 : f32 to vector<8x256xf32>
      %130 = arith.mulf %129, %127 : vector<8x256xf32>
      %131 = arith.addf %42, %130 : vector<8x256xf32>
      %cst_41 = arith.constant 0.000000e+00 : f32
      %132 = vector.broadcast %cst_41 : f32 to vector<8x17xf32>
      %133 = vector.extract_strided_slice %131 {offsets = [0, 0], sizes = [8, 239], strides = [1, 1]} : vector<8x256xf32> to vector<8x239xf32>
      %134 = tpu.concatenate %132, %133 in 1 : vector<8x17xf32>, vector<8x239xf32> -> vector<8x256xf32>
      %135 = vector.broadcast %20 : vector<1x256xf32> to vector<8x256xf32>
      %136 = arith.mulf %134, %135 : vector<8x256xf32>
      %cst_42 = arith.constant 0.000000e+00 : f32
      %137 = vector.broadcast %cst_42 : f32 to vector<8x16xf32>
      %138 = vector.extract_strided_slice %131 {offsets = [0, 0], sizes = [8, 240], strides = [1, 1]} : vector<8x256xf32> to vector<8x240xf32>
      %139 = tpu.concatenate %137, %138 in 1 : vector<8x16xf32>, vector<8x240xf32> -> vector<8x256xf32>
      %cst_43 = arith.constant 0.000000e+00 : f32
      %140 = vector.broadcast %cst_43 : f32 to vector<8x15xf32>
      %141 = vector.extract_strided_slice %131 {offsets = [0, 0], sizes = [8, 241], strides = [1, 1]} : vector<8x256xf32> to vector<8x241xf32>
      %142 = tpu.concatenate %140, %141 in 1 : vector<8x15xf32>, vector<8x241xf32> -> vector<8x256xf32>
      %143 = vector.broadcast %24 : vector<1x256xf32> to vector<8x256xf32>
      %144 = arith.mulf %142, %143 : vector<8x256xf32>
      %cst_44 = arith.constant 0.000000e+00 : f32
      %145 = vector.broadcast %cst_44 : f32 to vector<8x1xf32>
      %146 = vector.extract_strided_slice %131 {offsets = [0, 0], sizes = [8, 255], strides = [1, 1]} : vector<8x256xf32> to vector<8x255xf32>
      %147 = tpu.concatenate %145, %146 in 1 : vector<8x1xf32>, vector<8x255xf32> -> vector<8x256xf32>
      %148 = vector.broadcast %20 : vector<1x256xf32> to vector<8x256xf32>
      %149 = arith.mulf %147, %148 : vector<8x256xf32>
      %150 = vector.extract_strided_slice %131 {offsets = [0, 1], sizes = [8, 255], strides = [1, 1]} : vector<8x256xf32> to vector<8x255xf32>
      %cst_45 = arith.constant 0.000000e+00 : f32
      %151 = vector.broadcast %cst_45 : f32 to vector<8x1xf32>
      %152 = tpu.concatenate %150, %151 in 1 : vector<8x255xf32>, vector<8x1xf32> -> vector<8x256xf32>
      %153 = vector.broadcast %24 : vector<1x256xf32> to vector<8x256xf32>
      %154 = arith.mulf %152, %153 : vector<8x256xf32>
      %155 = vector.extract_strided_slice %131 {offsets = [0, 15], sizes = [8, 241], strides = [1, 1]} : vector<8x256xf32> to vector<8x241xf32>
      %cst_46 = arith.constant 0.000000e+00 : f32
      %156 = vector.broadcast %cst_46 : f32 to vector<8x15xf32>
      %157 = tpu.concatenate %155, %156 in 1 : vector<8x241xf32>, vector<8x15xf32> -> vector<8x256xf32>
      %158 = vector.broadcast %20 : vector<1x256xf32> to vector<8x256xf32>
      %159 = arith.mulf %157, %158 : vector<8x256xf32>
      %160 = vector.extract_strided_slice %131 {offsets = [0, 16], sizes = [8, 240], strides = [1, 1]} : vector<8x256xf32> to vector<8x240xf32>
      %cst_47 = arith.constant 0.000000e+00 : f32
      %161 = vector.broadcast %cst_47 : f32 to vector<8x16xf32>
      %162 = tpu.concatenate %160, %161 in 1 : vector<8x240xf32>, vector<8x16xf32> -> vector<8x256xf32>
      %163 = vector.extract_strided_slice %131 {offsets = [0, 17], sizes = [8, 239], strides = [1, 1]} : vector<8x256xf32> to vector<8x239xf32>
      %cst_48 = arith.constant 0.000000e+00 : f32
      %164 = vector.broadcast %cst_48 : f32 to vector<8x17xf32>
      %165 = tpu.concatenate %163, %164 in 1 : vector<8x239xf32>, vector<8x17xf32> -> vector<8x256xf32>
      %166 = vector.broadcast %24 : vector<1x256xf32> to vector<8x256xf32>
      %167 = arith.mulf %165, %166 : vector<8x256xf32>
      %168 = tpu.concatenate %136, %139, %144, %149, %131, %154, %159, %162, %167 in 0 : vector<8x256xf32>, vector<8x256xf32>, vector<8x256xf32>, vector<8x256xf32>, vector<8x256xf32>, vector<8x256xf32>, vector<8x256xf32>, vector<8x256xf32>, vector<8x256xf32> -> vector<72x256xf32>
      %c0_49 = arith.constant 0 : index
      %c0_50 = arith.constant 0 : index
      %169 = vector.load %arg4[%c0_49, %c0_50] : memref<8x72xf32, #tpu.memory_space<vmem>>, vector<8x72xf32>
      %cst_51 = arith.constant dense<0.000000e+00> : vector<8x256xf32>
      %170 = tpu.matmul %169, %168, %cst_51 {dimension_numbers = #tpu.dot_dimension_numbers<[1], [0], [0], [1], [0, 0, 1, 1], [], []>} : vector<8x72xf32>, vector<72x256xf32>, vector<8x256xf32> -> vector<8x256xf32>
      %c0_52 = arith.constant 0 : index
      %c0_53 = arith.constant 0 : index
      %171 = vector.load %arg5[%c0_52, %c0_53] : memref<8x1xf32, #tpu.memory_space<vmem>>, vector<8x1xf32>
      %172 = vector.broadcast %171 : vector<8x1xf32> to vector<8x256xf32>
      %173 = arith.addf %170, %172 : vector<8x256xf32>
      %174 = math.tanh %173 : vector<8x256xf32>
      %cst_54 = arith.constant 0.000000e+00 : f32
      %175 = vector.broadcast %cst_54 : f32 to vector<8x17xf32>
      %176 = vector.extract_strided_slice %174 {offsets = [0, 0], sizes = [8, 239], strides = [1, 1]} : vector<8x256xf32> to vector<8x239xf32>
      %177 = tpu.concatenate %175, %176 in 1 : vector<8x17xf32>, vector<8x239xf32> -> vector<8x256xf32>
      %178 = vector.broadcast %20 : vector<1x256xf32> to vector<8x256xf32>
      %179 = arith.mulf %177, %178 : vector<8x256xf32>
      %cst_55 = arith.constant 0.000000e+00 : f32
      %180 = vector.broadcast %cst_55 : f32 to vector<8x16xf32>
      %181 = vector.extract_strided_slice %174 {offsets = [0, 0], sizes = [8, 240], strides = [1, 1]} : vector<8x256xf32> to vector<8x240xf32>
      %182 = tpu.concatenate %180, %181 in 1 : vector<8x16xf32>, vector<8x240xf32> -> vector<8x256xf32>
      %cst_56 = arith.constant 0.000000e+00 : f32
      %183 = vector.broadcast %cst_56 : f32 to vector<8x15xf32>
      %184 = vector.extract_strided_slice %174 {offsets = [0, 0], sizes = [8, 241], strides = [1, 1]} : vector<8x256xf32> to vector<8x241xf32>
      %185 = tpu.concatenate %183, %184 in 1 : vector<8x15xf32>, vector<8x241xf32> -> vector<8x256xf32>
      %186 = vector.broadcast %24 : vector<1x256xf32> to vector<8x256xf32>
      %187 = arith.mulf %185, %186 : vector<8x256xf32>
      %cst_57 = arith.constant 0.000000e+00 : f32
      %188 = vector.broadcast %cst_57 : f32 to vector<8x1xf32>
      %189 = vector.extract_strided_slice %174 {offsets = [0, 0], sizes = [8, 255], strides = [1, 1]} : vector<8x256xf32> to vector<8x255xf32>
      %190 = tpu.concatenate %188, %189 in 1 : vector<8x1xf32>, vector<8x255xf32> -> vector<8x256xf32>
      %191 = vector.broadcast %20 : vector<1x256xf32> to vector<8x256xf32>
      %192 = arith.mulf %190, %191 : vector<8x256xf32>
      %193 = vector.extract_strided_slice %174 {offsets = [0, 1], sizes = [8, 255], strides = [1, 1]} : vector<8x256xf32> to vector<8x255xf32>
      %cst_58 = arith.constant 0.000000e+00 : f32
      %194 = vector.broadcast %cst_58 : f32 to vector<8x1xf32>
      %195 = tpu.concatenate %193, %194 in 1 : vector<8x255xf32>, vector<8x1xf32> -> vector<8x256xf32>
      %196 = vector.broadcast %24 : vector<1x256xf32> to vector<8x256xf32>
      %197 = arith.mulf %195, %196 : vector<8x256xf32>
      %198 = vector.extract_strided_slice %174 {offsets = [0, 15], sizes = [8, 241], strides = [1, 1]} : vector<8x256xf32> to vector<8x241xf32>
      %cst_59 = arith.constant 0.000000e+00 : f32
      %199 = vector.broadcast %cst_59 : f32 to vector<8x15xf32>
      %200 = tpu.concatenate %198, %199 in 1 : vector<8x241xf32>, vector<8x15xf32> -> vector<8x256xf32>
      %201 = vector.broadcast %20 : vector<1x256xf32> to vector<8x256xf32>
      %202 = arith.mulf %200, %201 : vector<8x256xf32>
      %203 = vector.extract_strided_slice %174 {offsets = [0, 16], sizes = [8, 240], strides = [1, 1]} : vector<8x256xf32> to vector<8x240xf32>
      %cst_60 = arith.constant 0.000000e+00 : f32
      %204 = vector.broadcast %cst_60 : f32 to vector<8x16xf32>
      %205 = tpu.concatenate %203, %204 in 1 : vector<8x240xf32>, vector<8x16xf32> -> vector<8x256xf32>
      %206 = vector.extract_strided_slice %174 {offsets = [0, 17], sizes = [8, 239], strides = [1, 1]} : vector<8x256xf32> to vector<8x239xf32>
      %cst_61 = arith.constant 0.000000e+00 : f32
      %207 = vector.broadcast %cst_61 : f32 to vector<8x17xf32>
      %208 = tpu.concatenate %206, %207 in 1 : vector<8x239xf32>, vector<8x17xf32> -> vector<8x256xf32>
      %209 = vector.broadcast %24 : vector<1x256xf32> to vector<8x256xf32>
      %210 = arith.mulf %208, %209 : vector<8x256xf32>
      %211 = tpu.concatenate %179, %182, %187, %192, %174, %197, %202, %205, %210 in 0 : vector<8x256xf32>, vector<8x256xf32>, vector<8x256xf32>, vector<8x256xf32>, vector<8x256xf32>, vector<8x256xf32>, vector<8x256xf32>, vector<8x256xf32>, vector<8x256xf32> -> vector<72x256xf32>
      %c0_62 = arith.constant 0 : index
      %c0_63 = arith.constant 0 : index
      %212 = vector.load %arg6[%c0_62, %c0_63] : memref<8x72xf32, #tpu.memory_space<vmem>>, vector<8x72xf32>
      %cst_64 = arith.constant dense<0.000000e+00> : vector<8x256xf32>
      %213 = tpu.matmul %212, %211, %cst_64 {dimension_numbers = #tpu.dot_dimension_numbers<[1], [0], [0], [1], [0, 0, 1, 1], [], []>} : vector<8x72xf32>, vector<72x256xf32>, vector<8x256xf32> -> vector<8x256xf32>
      %c0_65 = arith.constant 0 : index
      %c0_66 = arith.constant 0 : index
      %214 = vector.load %arg7[%c0_65, %c0_66] : memref<8x1xf32, #tpu.memory_space<vmem>>, vector<8x1xf32>
      %215 = vector.broadcast %214 : vector<8x1xf32> to vector<8x256xf32>
      %216 = arith.addf %213, %215 : vector<8x256xf32>
      %cst_67 = arith.constant 5.000000e-01 : f32
      %217 = arith.mulf %cst_67, %41 : f32
      %218 = vector.broadcast %217 : f32 to vector<8x256xf32>
      %219 = arith.mulf %218, %216 : vector<8x256xf32>
      %220 = arith.addf %42, %219 : vector<8x256xf32>
      %cst_68 = arith.constant 0.000000e+00 : f32
      %221 = vector.broadcast %cst_68 : f32 to vector<8x17xf32>
      %222 = vector.extract_strided_slice %220 {offsets = [0, 0], sizes = [8, 239], strides = [1, 1]} : vector<8x256xf32> to vector<8x239xf32>
      %223 = tpu.concatenate %221, %222 in 1 : vector<8x17xf32>, vector<8x239xf32> -> vector<8x256xf32>
      %224 = vector.broadcast %20 : vector<1x256xf32> to vector<8x256xf32>
      %225 = arith.mulf %223, %224 : vector<8x256xf32>
      %cst_69 = arith.constant 0.000000e+00 : f32
      %226 = vector.broadcast %cst_69 : f32 to vector<8x16xf32>
      %227 = vector.extract_strided_slice %220 {offsets = [0, 0], sizes = [8, 240], strides = [1, 1]} : vector<8x256xf32> to vector<8x240xf32>
      %228 = tpu.concatenate %226, %227 in 1 : vector<8x16xf32>, vector<8x240xf32> -> vector<8x256xf32>
      %cst_70 = arith.constant 0.000000e+00 : f32
      %229 = vector.broadcast %cst_70 : f32 to vector<8x15xf32>
      %230 = vector.extract_strided_slice %220 {offsets = [0, 0], sizes = [8, 241], strides = [1, 1]} : vector<8x256xf32> to vector<8x241xf32>
      %231 = tpu.concatenate %229, %230 in 1 : vector<8x15xf32>, vector<8x241xf32> -> vector<8x256xf32>
      %232 = vector.broadcast %24 : vector<1x256xf32> to vector<8x256xf32>
      %233 = arith.mulf %231, %232 : vector<8x256xf32>
      %cst_71 = arith.constant 0.000000e+00 : f32
      %234 = vector.broadcast %cst_71 : f32 to vector<8x1xf32>
      %235 = vector.extract_strided_slice %220 {offsets = [0, 0], sizes = [8, 255], strides = [1, 1]} : vector<8x256xf32> to vector<8x255xf32>
      %236 = tpu.concatenate %234, %235 in 1 : vector<8x1xf32>, vector<8x255xf32> -> vector<8x256xf32>
      %237 = vector.broadcast %20 : vector<1x256xf32> to vector<8x256xf32>
      %238 = arith.mulf %236, %237 : vector<8x256xf32>
      %239 = vector.extract_strided_slice %220 {offsets = [0, 1], sizes = [8, 255], strides = [1, 1]} : vector<8x256xf32> to vector<8x255xf32>
      %cst_72 = arith.constant 0.000000e+00 : f32
      %240 = vector.broadcast %cst_72 : f32 to vector<8x1xf32>
      %241 = tpu.concatenate %239, %240 in 1 : vector<8x255xf32>, vector<8x1xf32> -> vector<8x256xf32>
      %242 = vector.broadcast %24 : vector<1x256xf32> to vector<8x256xf32>
      %243 = arith.mulf %241, %242 : vector<8x256xf32>
      %244 = vector.extract_strided_slice %220 {offsets = [0, 15], sizes = [8, 241], strides = [1, 1]} : vector<8x256xf32> to vector<8x241xf32>
      %cst_73 = arith.constant 0.000000e+00 : f32
      %245 = vector.broadcast %cst_73 : f32 to vector<8x15xf32>
      %246 = tpu.concatenate %244, %245 in 1 : vector<8x241xf32>, vector<8x15xf32> -> vector<8x256xf32>
      %247 = vector.broadcast %20 : vector<1x256xf32> to vector<8x256xf32>
      %248 = arith.mulf %246, %247 : vector<8x256xf32>
      %249 = vector.extract_strided_slice %220 {offsets = [0, 16], sizes = [8, 240], strides = [1, 1]} : vector<8x256xf32> to vector<8x240xf32>
      %cst_74 = arith.constant 0.000000e+00 : f32
      %250 = vector.broadcast %cst_74 : f32 to vector<8x16xf32>
      %251 = tpu.concatenate %249, %250 in 1 : vector<8x240xf32>, vector<8x16xf32> -> vector<8x256xf32>
      %252 = vector.extract_strided_slice %220 {offsets = [0, 17], sizes = [8, 239], strides = [1, 1]} : vector<8x256xf32> to vector<8x239xf32>
      %cst_75 = arith.constant 0.000000e+00 : f32
      %253 = vector.broadcast %cst_75 : f32 to vector<8x17xf32>
      %254 = tpu.concatenate %252, %253 in 1 : vector<8x239xf32>, vector<8x17xf32> -> vector<8x256xf32>
      %255 = vector.broadcast %24 : vector<1x256xf32> to vector<8x256xf32>
      %256 = arith.mulf %254, %255 : vector<8x256xf32>
      %257 = tpu.concatenate %225, %228, %233, %238, %220, %243, %248, %251, %256 in 0 : vector<8x256xf32>, vector<8x256xf32>, vector<8x256xf32>, vector<8x256xf32>, vector<8x256xf32>, vector<8x256xf32>, vector<8x256xf32>, vector<8x256xf32>, vector<8x256xf32> -> vector<72x256xf32>
      %c0_76 = arith.constant 0 : index
      %c0_77 = arith.constant 0 : index
      %258 = vector.load %arg4[%c0_76, %c0_77] : memref<8x72xf32, #tpu.memory_space<vmem>>, vector<8x72xf32>
      %cst_78 = arith.constant dense<0.000000e+00> : vector<8x256xf32>
      %259 = tpu.matmul %258, %257, %cst_78 {dimension_numbers = #tpu.dot_dimension_numbers<[1], [0], [0], [1], [0, 0, 1, 1], [], []>} : vector<8x72xf32>, vector<72x256xf32>, vector<8x256xf32> -> vector<8x256xf32>
      %c0_79 = arith.constant 0 : index
      %c0_80 = arith.constant 0 : index
      %260 = vector.load %arg5[%c0_79, %c0_80] : memref<8x1xf32, #tpu.memory_space<vmem>>, vector<8x1xf32>
      %261 = vector.broadcast %260 : vector<8x1xf32> to vector<8x256xf32>
      %262 = arith.addf %259, %261 : vector<8x256xf32>
      %263 = math.tanh %262 : vector<8x256xf32>
      %cst_81 = arith.constant 0.000000e+00 : f32
      %264 = vector.broadcast %cst_81 : f32 to vector<8x17xf32>
      %265 = vector.extract_strided_slice %263 {offsets = [0, 0], sizes = [8, 239], strides = [1, 1]} : vector<8x256xf32> to vector<8x239xf32>
      %266 = tpu.concatenate %264, %265 in 1 : vector<8x17xf32>, vector<8x239xf32> -> vector<8x256xf32>
      %267 = vector.broadcast %20 : vector<1x256xf32> to vector<8x256xf32>
      %268 = arith.mulf %266, %267 : vector<8x256xf32>
      %cst_82 = arith.constant 0.000000e+00 : f32
      %269 = vector.broadcast %cst_82 : f32 to vector<8x16xf32>
      %270 = vector.extract_strided_slice %263 {offsets = [0, 0], sizes = [8, 240], strides = [1, 1]} : vector<8x256xf32> to vector<8x240xf32>
      %271 = tpu.concatenate %269, %270 in 1 : vector<8x16xf32>, vector<8x240xf32> -> vector<8x256xf32>
      %cst_83 = arith.constant 0.000000e+00 : f32
      %272 = vector.broadcast %cst_83 : f32 to vector<8x15xf32>
      %273 = vector.extract_strided_slice %263 {offsets = [0, 0], sizes = [8, 241], strides = [1, 1]} : vector<8x256xf32> to vector<8x241xf32>
      %274 = tpu.concatenate %272, %273 in 1 : vector<8x15xf32>, vector<8x241xf32> -> vector<8x256xf32>
      %275 = vector.broadcast %24 : vector<1x256xf32> to vector<8x256xf32>
      %276 = arith.mulf %274, %275 : vector<8x256xf32>
      %cst_84 = arith.constant 0.000000e+00 : f32
      %277 = vector.broadcast %cst_84 : f32 to vector<8x1xf32>
      %278 = vector.extract_strided_slice %263 {offsets = [0, 0], sizes = [8, 255], strides = [1, 1]} : vector<8x256xf32> to vector<8x255xf32>
      %279 = tpu.concatenate %277, %278 in 1 : vector<8x1xf32>, vector<8x255xf32> -> vector<8x256xf32>
      %280 = vector.broadcast %20 : vector<1x256xf32> to vector<8x256xf32>
      %281 = arith.mulf %279, %280 : vector<8x256xf32>
      %282 = vector.extract_strided_slice %263 {offsets = [0, 1], sizes = [8, 255], strides = [1, 1]} : vector<8x256xf32> to vector<8x255xf32>
      %cst_85 = arith.constant 0.000000e+00 : f32
      %283 = vector.broadcast %cst_85 : f32 to vector<8x1xf32>
      %284 = tpu.concatenate %282, %283 in 1 : vector<8x255xf32>, vector<8x1xf32> -> vector<8x256xf32>
      %285 = vector.broadcast %24 : vector<1x256xf32> to vector<8x256xf32>
      %286 = arith.mulf %284, %285 : vector<8x256xf32>
      %287 = vector.extract_strided_slice %263 {offsets = [0, 15], sizes = [8, 241], strides = [1, 1]} : vector<8x256xf32> to vector<8x241xf32>
      %cst_86 = arith.constant 0.000000e+00 : f32
      %288 = vector.broadcast %cst_86 : f32 to vector<8x15xf32>
      %289 = tpu.concatenate %287, %288 in 1 : vector<8x241xf32>, vector<8x15xf32> -> vector<8x256xf32>
      %290 = vector.broadcast %20 : vector<1x256xf32> to vector<8x256xf32>
      %291 = arith.mulf %289, %290 : vector<8x256xf32>
      %292 = vector.extract_strided_slice %263 {offsets = [0, 16], sizes = [8, 240], strides = [1, 1]} : vector<8x256xf32> to vector<8x240xf32>
      %cst_87 = arith.constant 0.000000e+00 : f32
      %293 = vector.broadcast %cst_87 : f32 to vector<8x16xf32>
      %294 = tpu.concatenate %292, %293 in 1 : vector<8x240xf32>, vector<8x16xf32> -> vector<8x256xf32>
      %295 = vector.extract_strided_slice %263 {offsets = [0, 17], sizes = [8, 239], strides = [1, 1]} : vector<8x256xf32> to vector<8x239xf32>
      %cst_88 = arith.constant 0.000000e+00 : f32
      %296 = vector.broadcast %cst_88 : f32 to vector<8x17xf32>
      %297 = tpu.concatenate %295, %296 in 1 : vector<8x239xf32>, vector<8x17xf32> -> vector<8x256xf32>
      %298 = vector.broadcast %24 : vector<1x256xf32> to vector<8x256xf32>
      %299 = arith.mulf %297, %298 : vector<8x256xf32>
      %300 = tpu.concatenate %268, %271, %276, %281, %263, %286, %291, %294, %299 in 0 : vector<8x256xf32>, vector<8x256xf32>, vector<8x256xf32>, vector<8x256xf32>, vector<8x256xf32>, vector<8x256xf32>, vector<8x256xf32>, vector<8x256xf32>, vector<8x256xf32> -> vector<72x256xf32>
      %c0_89 = arith.constant 0 : index
      %c0_90 = arith.constant 0 : index
      %301 = vector.load %arg6[%c0_89, %c0_90] : memref<8x72xf32, #tpu.memory_space<vmem>>, vector<8x72xf32>
      %cst_91 = arith.constant dense<0.000000e+00> : vector<8x256xf32>
      %302 = tpu.matmul %301, %300, %cst_91 {dimension_numbers = #tpu.dot_dimension_numbers<[1], [0], [0], [1], [0, 0, 1, 1], [], []>} : vector<8x72xf32>, vector<72x256xf32>, vector<8x256xf32> -> vector<8x256xf32>
      %c0_92 = arith.constant 0 : index
      %c0_93 = arith.constant 0 : index
      %303 = vector.load %arg7[%c0_92, %c0_93] : memref<8x1xf32, #tpu.memory_space<vmem>>, vector<8x1xf32>
      %304 = vector.broadcast %303 : vector<8x1xf32> to vector<8x256xf32>
      %305 = arith.addf %302, %304 : vector<8x256xf32>
      %306 = vector.broadcast %41 : f32 to vector<8x256xf32>
      %307 = arith.mulf %306, %305 : vector<8x256xf32>
      %308 = arith.addf %42, %307 : vector<8x256xf32>
      %cst_94 = arith.constant 0.000000e+00 : f32
      %309 = vector.broadcast %cst_94 : f32 to vector<8x17xf32>
      %310 = vector.extract_strided_slice %308 {offsets = [0, 0], sizes = [8, 239], strides = [1, 1]} : vector<8x256xf32> to vector<8x239xf32>
      %311 = tpu.concatenate %309, %310 in 1 : vector<8x17xf32>, vector<8x239xf32> -> vector<8x256xf32>
      %312 = vector.broadcast %20 : vector<1x256xf32> to vector<8x256xf32>
      %313 = arith.mulf %311, %312 : vector<8x256xf32>
      %cst_95 = arith.constant 0.000000e+00 : f32
      %314 = vector.broadcast %cst_95 : f32 to vector<8x16xf32>
      %315 = vector.extract_strided_slice %308 {offsets = [0, 0], sizes = [8, 240], strides = [1, 1]} : vector<8x256xf32> to vector<8x240xf32>
      %316 = tpu.concatenate %314, %315 in 1 : vector<8x16xf32>, vector<8x240xf32> -> vector<8x256xf32>
      %cst_96 = arith.constant 0.000000e+00 : f32
      %317 = vector.broadcast %cst_96 : f32 to vector<8x15xf32>
      %318 = vector.extract_strided_slice %308 {offsets = [0, 0], sizes = [8, 241], strides = [1, 1]} : vector<8x256xf32> to vector<8x241xf32>
      %319 = tpu.concatenate %317, %318 in 1 : vector<8x15xf32>, vector<8x241xf32> -> vector<8x256xf32>
      %320 = vector.broadcast %24 : vector<1x256xf32> to vector<8x256xf32>
      %321 = arith.mulf %319, %320 : vector<8x256xf32>
      %cst_97 = arith.constant 0.000000e+00 : f32
      %322 = vector.broadcast %cst_97 : f32 to vector<8x1xf32>
      %323 = vector.extract_strided_slice %308 {offsets = [0, 0], sizes = [8, 255], strides = [1, 1]} : vector<8x256xf32> to vector<8x255xf32>
      %324 = tpu.concatenate %322, %323 in 1 : vector<8x1xf32>, vector<8x255xf32> -> vector<8x256xf32>
      %325 = vector.broadcast %20 : vector<1x256xf32> to vector<8x256xf32>
      %326 = arith.mulf %324, %325 : vector<8x256xf32>
      %327 = vector.extract_strided_slice %308 {offsets = [0, 1], sizes = [8, 255], strides = [1, 1]} : vector<8x256xf32> to vector<8x255xf32>
      %cst_98 = arith.constant 0.000000e+00 : f32
      %328 = vector.broadcast %cst_98 : f32 to vector<8x1xf32>
      %329 = tpu.concatenate %327, %328 in 1 : vector<8x255xf32>, vector<8x1xf32> -> vector<8x256xf32>
      %330 = vector.broadcast %24 : vector<1x256xf32> to vector<8x256xf32>
      %331 = arith.mulf %329, %330 : vector<8x256xf32>
      %332 = vector.extract_strided_slice %308 {offsets = [0, 15], sizes = [8, 241], strides = [1, 1]} : vector<8x256xf32> to vector<8x241xf32>
      %cst_99 = arith.constant 0.000000e+00 : f32
      %333 = vector.broadcast %cst_99 : f32 to vector<8x15xf32>
      %334 = tpu.concatenate %332, %333 in 1 : vector<8x241xf32>, vector<8x15xf32> -> vector<8x256xf32>
      %335 = vector.broadcast %20 : vector<1x256xf32> to vector<8x256xf32>
      %336 = arith.mulf %334, %335 : vector<8x256xf32>
      %337 = vector.extract_strided_slice %308 {offsets = [0, 16], sizes = [8, 240], strides = [1, 1]} : vector<8x256xf32> to vector<8x240xf32>
      %cst_100 = arith.constant 0.000000e+00 : f32
      %338 = vector.broadcast %cst_100 : f32 to vector<8x16xf32>
      %339 = tpu.concatenate %337, %338 in 1 : vector<8x240xf32>, vector<8x16xf32> -> vector<8x256xf32>
      %340 = vector.extract_strided_slice %308 {offsets = [0, 17], sizes = [8, 239], strides = [1, 1]} : vector<8x256xf32> to vector<8x239xf32>
      %cst_101 = arith.constant 0.000000e+00 : f32
      %341 = vector.broadcast %cst_101 : f32 to vector<8x17xf32>
      %342 = tpu.concatenate %340, %341 in 1 : vector<8x239xf32>, vector<8x17xf32> -> vector<8x256xf32>
      %343 = vector.broadcast %24 : vector<1x256xf32> to vector<8x256xf32>
      %344 = arith.mulf %342, %343 : vector<8x256xf32>
      %345 = tpu.concatenate %313, %316, %321, %326, %308, %331, %336, %339, %344 in 0 : vector<8x256xf32>, vector<8x256xf32>, vector<8x256xf32>, vector<8x256xf32>, vector<8x256xf32>, vector<8x256xf32>, vector<8x256xf32>, vector<8x256xf32>, vector<8x256xf32> -> vector<72x256xf32>
      %c0_102 = arith.constant 0 : index
      %c0_103 = arith.constant 0 : index
      %346 = vector.load %arg4[%c0_102, %c0_103] : memref<8x72xf32, #tpu.memory_space<vmem>>, vector<8x72xf32>
      %cst_104 = arith.constant dense<0.000000e+00> : vector<8x256xf32>
      %347 = tpu.matmul %346, %345, %cst_104 {dimension_numbers = #tpu.dot_dimension_numbers<[1], [0], [0], [1], [0, 0, 1, 1], [], []>} : vector<8x72xf32>, vector<72x256xf32>, vector<8x256xf32> -> vector<8x256xf32>
      %c0_105 = arith.constant 0 : index
      %c0_106 = arith.constant 0 : index
      %348 = vector.load %arg5[%c0_105, %c0_106] : memref<8x1xf32, #tpu.memory_space<vmem>>, vector<8x1xf32>
      %349 = vector.broadcast %348 : vector<8x1xf32> to vector<8x256xf32>
      %350 = arith.addf %347, %349 : vector<8x256xf32>
      %351 = math.tanh %350 : vector<8x256xf32>
      %cst_107 = arith.constant 0.000000e+00 : f32
      %352 = vector.broadcast %cst_107 : f32 to vector<8x17xf32>
      %353 = vector.extract_strided_slice %351 {offsets = [0, 0], sizes = [8, 239], strides = [1, 1]} : vector<8x256xf32> to vector<8x239xf32>
      %354 = tpu.concatenate %352, %353 in 1 : vector<8x17xf32>, vector<8x239xf32> -> vector<8x256xf32>
      %355 = vector.broadcast %20 : vector<1x256xf32> to vector<8x256xf32>
      %356 = arith.mulf %354, %355 : vector<8x256xf32>
      %cst_108 = arith.constant 0.000000e+00 : f32
      %357 = vector.broadcast %cst_108 : f32 to vector<8x16xf32>
      %358 = vector.extract_strided_slice %351 {offsets = [0, 0], sizes = [8, 240], strides = [1, 1]} : vector<8x256xf32> to vector<8x240xf32>
      %359 = tpu.concatenate %357, %358 in 1 : vector<8x16xf32>, vector<8x240xf32> -> vector<8x256xf32>
      %cst_109 = arith.constant 0.000000e+00 : f32
      %360 = vector.broadcast %cst_109 : f32 to vector<8x15xf32>
      %361 = vector.extract_strided_slice %351 {offsets = [0, 0], sizes = [8, 241], strides = [1, 1]} : vector<8x256xf32> to vector<8x241xf32>
      %362 = tpu.concatenate %360, %361 in 1 : vector<8x15xf32>, vector<8x241xf32> -> vector<8x256xf32>
      %363 = vector.broadcast %24 : vector<1x256xf32> to vector<8x256xf32>
      %364 = arith.mulf %362, %363 : vector<8x256xf32>
      %cst_110 = arith.constant 0.000000e+00 : f32
      %365 = vector.broadcast %cst_110 : f32 to vector<8x1xf32>
      %366 = vector.extract_strided_slice %351 {offsets = [0, 0], sizes = [8, 255], strides = [1, 1]} : vector<8x256xf32> to vector<8x255xf32>
      %367 = tpu.concatenate %365, %366 in 1 : vector<8x1xf32>, vector<8x255xf32> -> vector<8x256xf32>
      %368 = vector.broadcast %20 : vector<1x256xf32> to vector<8x256xf32>
      %369 = arith.mulf %367, %368 : vector<8x256xf32>
      %370 = vector.extract_strided_slice %351 {offsets = [0, 1], sizes = [8, 255], strides = [1, 1]} : vector<8x256xf32> to vector<8x255xf32>
      %cst_111 = arith.constant 0.000000e+00 : f32
      %371 = vector.broadcast %cst_111 : f32 to vector<8x1xf32>
      %372 = tpu.concatenate %370, %371 in 1 : vector<8x255xf32>, vector<8x1xf32> -> vector<8x256xf32>
      %373 = vector.broadcast %24 : vector<1x256xf32> to vector<8x256xf32>
      %374 = arith.mulf %372, %373 : vector<8x256xf32>
      %375 = vector.extract_strided_slice %351 {offsets = [0, 15], sizes = [8, 241], strides = [1, 1]} : vector<8x256xf32> to vector<8x241xf32>
      %cst_112 = arith.constant 0.000000e+00 : f32
      %376 = vector.broadcast %cst_112 : f32 to vector<8x15xf32>
      %377 = tpu.concatenate %375, %376 in 1 : vector<8x241xf32>, vector<8x15xf32> -> vector<8x256xf32>
      %378 = vector.broadcast %20 : vector<1x256xf32> to vector<8x256xf32>
      %379 = arith.mulf %377, %378 : vector<8x256xf32>
      %380 = vector.extract_strided_slice %351 {offsets = [0, 16], sizes = [8, 240], strides = [1, 1]} : vector<8x256xf32> to vector<8x240xf32>
      %cst_113 = arith.constant 0.000000e+00 : f32
      %381 = vector.broadcast %cst_113 : f32 to vector<8x16xf32>
      %382 = tpu.concatenate %380, %381 in 1 : vector<8x240xf32>, vector<8x16xf32> -> vector<8x256xf32>
      %383 = vector.extract_strided_slice %351 {offsets = [0, 17], sizes = [8, 239], strides = [1, 1]} : vector<8x256xf32> to vector<8x239xf32>
      %cst_114 = arith.constant 0.000000e+00 : f32
      %384 = vector.broadcast %cst_114 : f32 to vector<8x17xf32>
      %385 = tpu.concatenate %383, %384 in 1 : vector<8x239xf32>, vector<8x17xf32> -> vector<8x256xf32>
      %386 = vector.broadcast %24 : vector<1x256xf32> to vector<8x256xf32>
      %387 = arith.mulf %385, %386 : vector<8x256xf32>
      %388 = tpu.concatenate %356, %359, %364, %369, %351, %374, %379, %382, %387 in 0 : vector<8x256xf32>, vector<8x256xf32>, vector<8x256xf32>, vector<8x256xf32>, vector<8x256xf32>, vector<8x256xf32>, vector<8x256xf32>, vector<8x256xf32>, vector<8x256xf32> -> vector<72x256xf32>
      %c0_115 = arith.constant 0 : index
      %c0_116 = arith.constant 0 : index
      %389 = vector.load %arg6[%c0_115, %c0_116] : memref<8x72xf32, #tpu.memory_space<vmem>>, vector<8x72xf32>
      %cst_117 = arith.constant dense<0.000000e+00> : vector<8x256xf32>
      %390 = tpu.matmul %389, %388, %cst_117 {dimension_numbers = #tpu.dot_dimension_numbers<[1], [0], [0], [1], [0, 0, 1, 1], [], []>} : vector<8x72xf32>, vector<72x256xf32>, vector<8x256xf32> -> vector<8x256xf32>
      %c0_118 = arith.constant 0 : index
      %c0_119 = arith.constant 0 : index
      %391 = vector.load %arg7[%c0_118, %c0_119] : memref<8x1xf32, #tpu.memory_space<vmem>>, vector<8x1xf32>
      %392 = vector.broadcast %391 : vector<8x1xf32> to vector<8x256xf32>
      %393 = arith.addf %390, %392 : vector<8x256xf32>
      %cst_120 = arith.constant 6.000000e+00 : f32
      %394 = arith.divf %41, %cst_120 : f32
      %cst_121 = arith.constant 2.000000e+00 : f32
      %395 = vector.broadcast %cst_121 : f32 to vector<8x256xf32>
      %396 = arith.mulf %395, %216 : vector<8x256xf32>
      %397 = arith.addf %127, %396 : vector<8x256xf32>
      %cst_122 = arith.constant 2.000000e+00 : f32
      %398 = vector.broadcast %cst_122 : f32 to vector<8x256xf32>
      %399 = arith.mulf %398, %305 : vector<8x256xf32>
      %400 = arith.addf %397, %399 : vector<8x256xf32>
      %401 = arith.addf %400, %393 : vector<8x256xf32>
      %402 = vector.broadcast %394 : f32 to vector<8x256xf32>
      %403 = arith.mulf %402, %401 : vector<8x256xf32>
      %404 = arith.addf %42, %403 : vector<8x256xf32>
      %c0_123 = arith.constant 0 : index
      %c0_124 = arith.constant 0 : index
      %405 = vector.load %arg9[%c0_123, %c0_124] : memref<8x256xf32, #tpu.memory_space<vmem>>, vector<8x256xf32>
      tpu.vector_store %arg9[%c0_123, %c0_124], %404 {strides = array<i32>} : memref<8x256xf32, #tpu.memory_space<vmem>>, vector<8x256xf32>,
    } else {
    }
    return
  }
  func.func @transform_0(%arg0: i32, %arg1: i32) -> i32 {
    %c0_i32 = arith.constant 0 : i32
    %c0_i32_0 = arith.constant 0 : i32
    return %c0_i32 : i32
  }
  func.func @transform_1(%arg0: i32, %arg1: i32) -> (i32, i32, i32) {
    %c0_i32 = arith.constant 0 : i32
    %c0_i32_0 = arith.constant 0 : i32
    %c0_i32_1 = arith.constant 0 : i32
    return %arg0, %c0_i32, %c0_i32_0 : i32, i32, i32
  }
  func.func @transform_2(%arg0: i32, %arg1: i32) -> (i32, i32) {
    %c0_i32 = arith.constant 0 : i32
    %c0_i32_0 = arith.constant 0 : i32
    %c0_i32_1 = arith.constant 0 : i32
    return %c0_i32, %c0_i32_0 : i32, i32
  }
  func.func @transform_3(%arg0: i32, %arg1: i32) -> (i32, i32) {
    %c0_i32 = arith.constant 0 : i32
    %c0_i32_0 = arith.constant 0 : i32
    %c0_i32_1 = arith.constant 0 : i32
    return %c0_i32, %c0_i32_0 : i32, i32
  }
  func.func @transform_4(%arg0: i32, %arg1: i32) -> (i32, i32) {
    %c0_i32 = arith.constant 0 : i32
    %c0_i32_0 = arith.constant 0 : i32
    %c0_i32_1 = arith.constant 0 : i32
    return %c0_i32, %c0_i32_0 : i32, i32
  }
  func.func @transform_5(%arg0: i32, %arg1: i32) -> (i32, i32) {
    %c0_i32 = arith.constant 0 : i32
    %c0_i32_0 = arith.constant 0 : i32
    %c0_i32_1 = arith.constant 0 : i32
    return %c0_i32, %c0_i32_0 : i32, i32
  }
  func.func @transform_6(%arg0: i32, %arg1: i32) -> (i32, i32, i32, i32) {
    %c0_i32 = arith.constant 0 : i32
    %c0_i32_0 = arith.constant 0 : i32
    %c0_i32_1 = arith.constant 0 : i32
    return %arg0, %arg1, %c0_i32, %c0_i32_0 : i32, i32, i32, i32
  }
}

</mosaic_0001>

<bundles_post_ra>
// kernel: tpu_custom_call.1
= control target key start
LH: loop header
LB: loop body
LE: loop exit
PB: predicated region body
PF: predicated region fallthrough
CT: control target
= control target key end

     0   :  { %s2654_s0 = inlined_call_operand.vmem [shape: f32[8], index: 0, kind: input, shape index: {}]   ;;  %s2655_s1 = inlined_call_operand.hbm [shape: f32[2,8,256], index: 1, kind: input, shape index: {}]   ;;  %s2656_s2 = inlined_call_operand.vmem [shape: f32[8,72], index: 2, kind: input, shape index: {}]   ;;  %s2657_s3 = inlined_call_operand.vmem [shape: f32[8,1], index: 3, kind: input, shape index: {}]   ;;  %s2658_s4 = inlined_call_operand.vmem [shape: f32[8,72], index: 4, kind: input, shape index: {}]   ;;  %s2659_s5 = inlined_call_operand.vmem [shape: f32[8,1], index: 5, kind: input, shape index: {}]   ;;  %s2660_s6 = inlined_call_operand.hbm [shape: f32[2,8,4,256], index: 6, kind: output, shape index: {}]  }
   0x1   :  { %2669 = sst [smem:[#allocation18_spill]] %s2654_s0 }
   0x2   :  { %2670 = sst [smem:[#allocation19_spill]] %s2655_s1 }
   0x3   :  { %2671 = sst [smem:[#allocation20_spill]] %s2658_s4 }
   0x4   :  { %2672 = sst [smem:[#allocation21_spill]] %s2659_s5 }
   0x5   :  { %2673 = sst [smem:[#allocation22_spill]] %s2660_s6 }
   0x6   :  { %11 = vsyncpa [#allocation6], 0 }
   0x7   :  { %12 = vsyncpa [#allocation4], 0 }
   0x8   :  { %14 = vsyncpa [#allocation4 + $0x1], 0 }
   0x9   :  { %15 = vsyncpa [#allocation5], 0 }
   0xa   :  { %17 = vsyncpa [#allocation5 + $0x1], 0  ;;  %s1936_s21 = smov 0   ;;  %s1938_s22 = smov 0  }
   0xb   :  { %s1940_s23 = smov 0   ;;  %s1942_s24 = smov 0  }
   0xc   :  { %s1944_s25 = smov 0   ;;  %s1946_s26 = smov 0  }
   0xd   :  { %s1948_s27 = smov 0   ;;  %s1950_s28 = smov 0  }
   0xe   :  { %s1952_s29 = smov 0   ;;  %s1954_s30 = smov 0  }
   0xf   :  { %s1956_s7 = smov 0  }
  0x10 LB: > { %2674 = sst [smem:[#allocation12_spill]] %s1847_s21  ;;  %s1501_s8 = sadd.s32 4294967295, %s1887_s7   ;;  %s1887_s7 = sphi %s1956_s7, %s23_s7   ;;  %s1883_s30 = sphi %s1954_s30, %s2709_s30   ;;  %s1879_s29 = sphi %s1952_s29, %s2708_s29   ;;  %s1875_s28 = sphi %s1950_s28, %s2707_s28   ;;  %s1871_s27 = sphi %s1948_s27, %s2698_s27   ;;  %s1867_s26 = sphi %s1946_s26, %s2706_s26   ;;  %s1863_s25 = sphi %s1944_s25, %s2705_s25   ;;  %s1859_s24 = sphi %s1942_s24, %s2704_s24   ;;  %s1855_s23 = sphi %s1940_s23, %s2703_s23   ;;  %s1851_s22 = sphi %s1938_s22, %s2702_s22   ;;  %s1847_s21 = sphi %s1936_s21, %s2701_s21  }
  0x11   : > { %2675 = sst [smem:[#allocation13_spill]] %s1875_s28  ;;  %s1502_s9 = sadd.s32 4294967294, %s1887_s7  }
  0x12   : > { %2676 = sst [smem:[#allocation14_spill]] %s1879_s29  ;;  %p76_p0 = scmp.ne.s32.totalorder %s1863_s25, %s1859_s24 }
  0x13   : > { %p1992_p1 = scmp.eq.s32.totalorder %s1501_s8, 0  ;;  %p185_p2 = scmp.ne.s32.totalorder %s1855_s23, %s1851_s22 }
  0x14   : > { %p186_p4 = scmp.eq.s32.totalorder %s1501_s8, 15  ;;  %p191_p5 = scmp.ne.s32.totalorder %s1851_s22, %s1847_s21 }
  0x15   : > { %p2001_p3 = por %p1992_p1, %p76_p0  ;;  %p192_p6 = scmp.eq.s32.totalorder %s1502_s9, 15 }
  0x16   : > { %p2007_p7 = por %p186_p4, %p185_p2  ;;  %p1503_p8 = scmp.ge.s32.totalorder %s1887_s7, 1 }
  0x17   : > { %p2012_p9 = por %p192_p6, %p191_p5  ;;  %p199_p10 = scmp.lt.s32.totalorder %s1887_s7, 17 }
  0x18   : > { %s2679_s13 = scalar_select %p2007_p7, 1, 0 }
  0x19   : > { %s2681_s14 = scalar_select %p2012_p9, 1, 0 }
  0x1a   : > { %2680 = sst [smem:[#allocation15_spill]] %s2679_s13  ;;  %p2020_p11 = pnand %p1503_p8, %p199_p10 }
  0x1b   : > { %2682 = sst [smem:[#allocation16_spill]] %s2681_s14  ;;  %s32_s19 = sadd.s32 1, %s1879_s29 }
  0x1c   : > { %s2683_s0 = sld [smem:[#allocation18_spill]]  ;;  %p1576_p12 = pneg %p2020_p11 }
  0x1d   : > { %s1889_s20 = smov [#allocation3]   ;;  %p33_p0 = scmp.ge.s32.totalorder %s32_s19, 8 }
  0x1e   : > { %p1577_p13 = pnand %p1576_p12, %p1992_p1  ;;  %s35_s24 = sadd.s32 1, %s1883_s30 }
  0x1f   : > { %s63_s8 = sadd.s32 1, %s1867_s26  ;;  %p70_p2 = scmp.ne.s32.totalorder %s1867_s26, %s1863_s25 }
  0x20   : > { %s2711_s19 = smov (%p33_p0, %s32_s19), 0  ;;  %s2713_s24 = smov (!%p33_p0, %s35_s24), %s1883_s30 }
  0x21   : > { %2685 = sst [smem:[#allocation17_spill]] %s2711_s19  ;;  %p71_p4 = scmp.eq.s32.totalorder %s1887_s7, 0 }
  0x22   : > { %s211_s17 = sshll.u32 %s2683_s0, 4  ;;  %s171_s9 = ssub.s32 %s1879_s29, %s2711_s19  ;;  %s212_s17 = int_to_ptr.vmem [resolvable:$true] %s211_s17 }
  0x23   : > { %1579 = dma.vmem_to_smem (!%p1577_p13), %s212_s17, 16, %s1889_s20, [#allocation6]  }
  0x24   : > { %p37_p5 = scmp.ge.s32.totalorder %s2713_s24, 2  ;;  %p1589_p6 = scmp.lt.s32.totalorder %s1887_s7, 16 }
  0x25   : > { %p2040_p8 = por %p71_p4, %p70_p2  ;;  %s234_s16 = sand.u32 1, %s1867_s26  }
  0x26   : > { %s2715_s24 = smov (%p37_p5, %s2713_s24), 0  ;;  %s1506_s17 = sshll.u32 %s234_s16, 4 }
  0x27   : > { %s60_s20 = ssub.s32 %s1883_s30, %s2715_s24  ;;  %s1565_s0 = sshll.u32 %s1883_s30, 4 }
  0x28   : > { %p61_p10 = scmp.eq.s32.totalorder %s60_s20, 0  ;;  %s172_s11 = sor.u32 %s171_s9, %s60_s20 }
  0x29   : > { %p173_p12 = scmp.eq.s32.totalorder %s172_s11, 0  ;;  %s2687_s19 = sadd.s32 1, %s1855_s23 }
  0x2a   : > { %s2051_s14 = scalar_select %p61_p10, %s1867_s26, %s63_s8  }
  0x2b   : > { %s2056_s29 = scalar_select %p173_p12, %s1855_s23, %s2687_s19  }
  0x2c   : > { %s2688_s1 = sld [smem:[#allocation19_spill]]  ;;  %s238_s28 = scalar_lea.vmem [#allocation7], %s1506_s17 }
  0x2d   : > { %s247_s4 = sshll.u32 %s238_s28, 4  ;;  %p1581_p13 = pnand %p1589_p6, %p2040_p8  ;;  %s248_s4 = int_to_ptr.vmem [resolvable:$true] %s247_s4 }
  0x2e   : > { %s235_s9 = scalar_lea.sflag [#allocation4], %s234_s16 }
  0x30   : > { %256 = sbr.rel (%p2020_p11) target bundleno = 2436 (0x984), region = 44 }
  0x32   : > { %s243_s13 = scalar_lea.hbm %s2688_s1, %s1565_s0 }
  0x33   : > { %s245_s5 = sshll.u32 %s243_s13, 4  ;;  %s246_s5 = int_to_ptr.hbm [resolvable:$true] %s245_s5 }
  0x34   : > { %1583 = dma.hbm_to_vmem [thread:$0]  (!%p1581_p13), %s246_s5, 256, %s248_s4, %s235_s9  }
  0x35   : > { %1834 = dma.done.wait (%p1992_p1), [#allocation6], 16  }
  0x36   : > { %1836 = vsyncadd (%p1992_p1), [#allocation6], 4294967280  ;;  %s263_s0 = sand.u32 1, %s1863_s25  }
  0x37   : > { %s1511_s6 = sshll.u32 %s263_s0, 4  ;;  %s264_s21 = scalar_lea.sflag [#allocation4], %s263_s0 }
  0x38   : > { %s267_s28 = scalar_lea.vmem [#allocation7], %s1511_s6 }
  0x39   : > { %1838 = dma.done.wait (%p2001_p3), %s264_s21, 256  }
  0x3a   : > { %1840 = vsyncadd (%p2001_p3), %s264_s21, 4294967040 }
  0x3b   : > { %273 = sfence }
  0x3c   : > { %s295_s4 = sand.u32 1, %s1851_s22   ;;  %v298_v0 = vlaneseq  ;;  %v1890_v5 = vmov 0.0   ;;  %p1517_p1 = scmp.ne.s32.totalorder %s1871_s27, 0 }
  0x3d   : > { %s2079_s5 = sshll.u32 %s295_s4, 3 }
  0x3e   : > { %v299_v1 = vand.u32 127, %v298_v0  ;;  %s297_s10 = scalar_lea.vmem [#allocation8], %s2079_s5 }
  0x40   : > { %v300_v2 = vadd.s32 128, %v299_v1  ;;  %v305_v3 = vand.u32 15, %v299_v1 }
  0x41   : > { %340 = sbr.rel (%p1517_p1) target bundleno = 73 (0x49), region = 56 }
  0x42   : > { %v312_v4 = vand.u32 15, %v300_v2  ;;  %vm325_vm0 = vcmp.ne.s32.totalorder %v305_v3, 0  ;;  %vm331_vm1 = vcmp.ne.s32.totalorder %v305_v3, 15 }
  0x43   : > { %v2081_v6 = vsel %vm325_vm0, 1.0, %v1890_v5  ;;  %v2083_v7 = vsel %vm331_vm1, 1.0, %v1890_v5 }
  0x44   : > { %vm326_vm2 = vcmp.ne.s32.totalorder %v312_v4, 0  ;;  %vm332_vm3 = vcmp.ne.s32.totalorder %v312_v4, 15 }
  0x45   : > { %v2085_v8 = vsel %vm326_vm2, 1.0, %v1890_v5  ;;  %v2087_v9 = vsel %vm332_vm3, 1.0, %v1890_v5 }
  0x46   : > { %v341_v10 = vld [vmem:[%s267_s28] sm:$0xff]  ;;  %v342_v11 = vld [vmem:[%s267_s28 + $0x8] sm:$0xff] }
  0x47   : > { %343 = vst [vmem:[#allocation2] sm:$0xff] %v341_v10 }
  0x48   : > { %344 = vst [vmem:[#allocation2 + $0x8] sm:$0xff] %v342_v11 }
  0x49 PF: > { %vm350_vm4 = vcmask 1043456   ;;  %p1518_p3 = scmp.ge.s32.totalorder %s1871_s27, 7 }
  0x4a   : > { %s1891_s11 = smov (!%p1518_p3), 113   ;;  %s1892_s12 = smov (!%p1518_p3), 111  }
  0x4b   : > { %s1893_s13 = smov (!%p1518_p3), 112   ;;  %s1894_s18 = smov (!%p1518_p3), 127  }
  0x4c   : > { %s1895_s19 = smov (!%p1518_p3), 1   ;;  %s1896_s8 = smov (!%p1518_p3), 15  }
  0x4d   : > { %s1897_s15 = smov (!%p1518_p3), 17   ;;  %s1898_s16 = smov (!%p1518_p3), 16  }
  0x4e   : > { %v345_v12 = vld [vmem:[#allocation2] sm:$0xff]  ;;  %s2691_s28 = sld [smem:[#allocation21_spill]] (!%p1518_p3)  ;;  %s358_s0 = sadd.s32 (!%p1518_p3), 1, %s1871_s27 }
  0x4f   : > { %v346_v13 = vld [vmem:[#allocation2 + $0x8] sm:$0xff]  ;;  %357 = sbr.rel (%p1518_p3) target bundleno = 2413 (0x96d), region = 60  ;;  %s2692_s9 = sld [smem:[#allocation20_spill]] (!%p1518_p3) }
  0x50   : > { %v349_v14 = vrot.slane %v346_v13, 4  ;;  %s359_s6 = sld [smem:[#allocation3 + %s358_s0]] (!%p1518_p3) }
  0x51   : > { %s360_s21 = sld [smem:[#allocation3 + %s1871_s27]] (!%p1518_p3) }
  0x52   : > { %v351_v15 = vsel %vm350_vm4, %v345_v12, %v349_v14 }
  0x53   : > { %353 = vst [vmem:[%s297_s10] sm:$0xff] %v351_v15 }
  0x54   : > { %v2094_v16 = vld [vmem:[#allocation2] sm:$0xff]  ;;  %v2102_v17 = vld [vmem:[#allocation2 + $0x8] sm:$0xff]  ;;  %vm443_vm5 = vcmask 908288   ;;  %vm423_vm6 = vcmask 924672   ;;  %vm434_vm7 = vcmask 916480   ;;  %vm412_vm8 = vcmask 1039360  }
  0x55   : > { %419 = vrot.lane.b32.xlu1 %v2094_v16, %s1891_s11  ;;  %439 = vrot.lane.b32.xlu0 %v2094_v16, %s1892_s12  ;;  %vm401_vm9 = vcmask 7168   ;;  %v451_v34 = vld [vmem:[%s2657_s3] sm:$0xff]  ;;  %v1899_v35 = vmov 0   ;;  %vm390_vm10 = vcmask 121856   ;;  %vm381_vm11 = vcmask 130048  }
  0x56   : > { %430 = vrot.lane.b32.xlu2 %v2094_v16, %s1893_s13  ;;  %1692 = vset.pattern.permute.xlu1 %v1899_v35  ;;  %vm2158_vm12 = vmneg %vm381_vm11  ;;  %vm370_vm13 = vcmask 138240   ;;  %v2169_v58 = vld [vmem:[%s2656_s2] sm:$0xff]  ;;  %vm457_vm14 = vcmask 588800  }
  0x57   : > { %1693 = vset.pattern.permute.xlu0 %v1899_v35 }
  0x5d   : > { %421 = vrot.lane.b32.xlu1 %v2102_v17, %s1891_s11  ;;  %441 = vrot.lane.b32.xlu0 %v2102_v17, %s1892_s12 }
  0x5e   : > { %432 = vrot.lane.b32.xlu2 %v2102_v17, %s1893_s13 }
  0x65   : > { %410 = vrot.lane.b32.xlu1 %v2102_v17, %s1894_s18  ;;  %408 = vrot.lane.b32.xlu0 %v2094_v16, %s1894_s18 }
  0x66   : > { %397 = vrot.lane.b32.xlu2 %v2094_v16, %s1895_s19 }
  0x6d   : > { %386 = vrot.lane.b32.xlu1 %v2094_v16, %s1896_s8  ;;  %399 = vrot.lane.b32.xlu0 %v2102_v17, %s1895_s19 }
  0x6e   : > { %388 = vrot.lane.b32.xlu2 %v2102_v17, %s1896_s8 }
  0x75   : > { %368 = vrot.lane.b32.xlu1 %v2102_v17, %s1897_s15  ;;  %366 = vrot.lane.b32.xlu0 %v2094_v16, %s1897_s15 }
  0x76   : > { %377 = vrot.lane.b32.xlu2 %v2094_v16, %s1898_s16 }
  0x7d   : > { %379 = vrot.lane.b32.xlu0 %v2102_v17, %s1898_s16  ;;  %454 = vperm.xlu1 %1692, %v451_v34  }
  0xb0   : > { %v431_v18 = vpop.permute.xlu2 %430 }
  0xb8   : > { %v433_v19 = vpop.permute.xlu2 %432 }
  0xb9   : > { %v435_v32 = vsel %vm434_vm7, %v431_v18, %v433_v19 }
  0xc0   : > { %v398_v22 = vpop.permute.xlu2 %397 }
  0xc1   : > { %v405_v41 = vsel %vm401_vm9, 0.0, %v398_v22 }
  0xc2   : > { %v406_v44 = vmul.f32 %v2081_v6, %v405_v41 }
  0xc7   : > { %v420_v20 = vpop.permute.xlu1 %419  ;;  %v440_v21 = vpop.permute.xlu0 %439 }
  0xc8   : > { %v389_v40 = vpop.permute.xlu2 %388 }
  0xcf   : > { %v422_v23 = vpop.permute.xlu1 %421  ;;  %v442_v24 = vpop.permute.xlu0 %441 }
  0xd0   : > { %v444_v25 = vsel %vm443_vm5, %v440_v21, %v442_v24  ;;  %v447_v26 = vsel %vm443_vm5, %v442_v24, 0.0  ;;  %v427_v27 = vsel %vm423_vm6, %v422_v23, 0.0  ;;  %v424_v30 = vsel %vm423_vm6, %v420_v20, %v422_v23  ;;  %v378_v53 = vpop.permute.xlu2 %377  ;;  %v582_v24 = vld [vmem:[%s2691_s28] sm:$0xff]  ;;  %s2241_s28 = ssub.f32 %s359_s6, %s360_s21 }
  0xd1   : > { %v448_v28 = vmul.f32 %v2083_v7, %v444_v25  ;;  %v449_v29 = vmul.f32 %v2087_v9, %v447_v26  ;;  %v429_v31 = vmul.f32 %v2085_v8, %v427_v27  ;;  %v428_v33 = vmul.f32 %v2081_v6, %v424_v30 }
  0xd2   : > { %s631_s17 = smul.f32 0.5, %s2241_s28 }
  0xd3   : > { %468 = vmatpush.msra.mxu0 %v448_v28  ;;  %488 = vmatpush.msra.mxu1 %v449_v29 }
  0xd5   : > { %469 = vmatpush.msra.mxu0 %v435_v32  ;;  %1522 = vmatpush.msk.msra.mxu1 %vm434_vm7, %v433_v19 }
  0xd7   : > { %v411_v36 = vpop.permute.xlu1 %410  ;;  %470 = vmatpush.msra.mxu0 %v428_v33  ;;  %v409_v37 = vpop.permute.xlu0 %408  ;;  %490 = vmatpush.msra.mxu1 %v429_v31 }
  0xd8   : > { %v413_v38 = vsel %vm412_vm8, %v409_v37, %v411_v36  ;;  %v416_v39 = vsel %vm412_vm8, %v411_v36, 0.0 }
  0xd9   : > { %v417_v42 = vmul.f32 %v2083_v7, %v413_v38  ;;  %v418_v43 = vmul.f32 %v2087_v9, %v416_v39 }
  0xdb   : > { %471 = vmatpush.msra.mxu0 %v417_v42  ;;  %491 = vmatpush.msra.mxu1 %v418_v43 }
  0xdd   : > { %472 = vmatpush.msra.mxu0 %v2094_v16  ;;  %492 = vmatpush.msra.mxu1 %v2102_v17 }
  0xdf   : > { %v387_v45 = vpop.permute.xlu1 %386  ;;  %v400_v46 = vpop.permute.xlu0 %399  ;;  %473 = vmatpush.msra.mxu0 %v406_v44 }
  0xe0   : > { %v402_v47 = vsel %vm401_vm9, %v398_v22, %v400_v46  ;;  %v394_v48 = vsel %vm390_vm10, 0.0, %v387_v45  ;;  %v391_v49 = vsel %vm390_vm10, %v387_v45, %v389_v40 }
  0xe1   : > { %v407_v50 = vmul.f32 %v2085_v8, %v402_v47  ;;  %v395_v51 = vmul.f32 %v2083_v7, %v394_v48  ;;  %v396_v52 = vmul.f32 %v2087_v9, %v391_v49 }
  0xe3   : > { %493 = vmatpush.msra.mxu1 %v407_v50  ;;  %474 = vmatpush.msra.mxu0 %v395_v51 }
  0xe5   : > { %1520 = vmatpush.msk.msra.mxu0 %vm2158_vm12, %v378_v53  ;;  %494 = vmatpush.msra.mxu1 %v396_v52 }
  0xe7   : > { %v367_v55 = vpop.permute.xlu0 %366  ;;  %v369_v59 = vpop.permute.xlu1 %368 }
  0xe8   : > { %v374_v56 = vsel %vm370_vm13, 0.0, %v367_v55  ;;  %v371_v60 = vsel %vm370_vm13, %v367_v55, %v369_v59 }
  0xe9   : > { %v375_v57 = vmul.f32 %v2081_v6, %v374_v56  ;;  %v376_v63 = vmul.f32 %v2085_v8, %v371_v60 }
  0xeb   : > { %476 = vmatpush.msra.mxu0 %v375_v57 }
  0xec   : > { %1521 = vmatmul.msk.f32.vlgmr.msra.gmra.mxu0 %vm457_vm14, %v2169_v58 }
  0xef   : > { %v380_v61 = vpop.permute.xlu0 %379  ;;  %v2178_v0 = vpop.permute.xlu1 %454 }
  0xf0   : > { %v382_v62 = vsel %vm381_vm11, %v378_v53, %v380_v61  ;;  %v2231_v53 = vld [vmem:[%s2692_s9] sm:$0xff]  ;;  %v2246_v61 = vstv %s631_s17 }
  0xf1   : > { %495 = vmatpush.msra.mxu1 %v382_v62 }
  0xf3   : > { %496 = vmatpush.msra.mxu1 %v376_v63 }
  0xf4   : > { %1523 = vmatmul.msk.f32.vlgmr.msra.gmra.mxu1 %vm457_vm14, %v2169_v58 }
 0x169   : > { %v478_v1 = vpop.f32.mrf.mxu0 }
 0x16a   : > { %v479_v2 = vadd.f32 %v478_v1, %v2178_v0 }
 0x16c   : > { %1694 = vtanh.f32 %v479_v2 }
 0x171   : > { %v498_v3 = vpop.f32.mrf.mxu1 }
 0x172   : > { %v1695_v4 = vpop.eup %1694  ;;  %v499_v5 = vadd.f32 %v498_v3, %v2178_v0 }
 0x173   : > { %553 = vrot.lane.b32.xlu1 %v1695_v4, %s1891_s11  ;;  %571 = vrot.lane.b32.xlu2 %v1695_v4, %s1892_s12 }
 0x174   : > { %1696 = vtanh.f32 %v499_v5 }
 0x17a   : > { %v1697_v10 = vpop.eup %1696 }
 0x17b   : > { %565 = vrot.lane.b32.xlu1 %v1697_v10, %s1893_s13  ;;  %555 = vrot.lane.b32.xlu2 %v1697_v10, %s1891_s11 }
 0x17c   : > { %573 = vrot.lane.b32.xlu0 %v1697_v10, %s1892_s12 }
 0x183   : > { %533 = vrot.lane.b32.xlu1 %v1695_v4, %s1895_s19  ;;  %543 = vrot.lane.b32.xlu2 %v1695_v4, %s1894_s18 }
 0x184   : > { %563 = vrot.lane.b32.xlu0 %v1695_v4, %s1893_s13 }
 0x18b   : > { %525 = vrot.lane.b32.xlu1 %v1697_v10, %s1896_s8  ;;  %535 = vrot.lane.b32.xlu2 %v1697_v10, %s1895_s19 }
 0x18c   : > { %545 = vrot.lane.b32.xlu0 %v1697_v10, %s1894_s18 }
 0x193   : > { %515 = vrot.lane.b32.xlu1 %v1695_v4, %s1898_s16  ;;  %505 = vrot.lane.b32.xlu2 %v1695_v4, %s1897_s15 }
 0x194   : > { %523 = vrot.lane.b32.xlu0 %v1695_v4, %s1896_s8 }
 0x19b   : > { %517 = vrot.lane.b32.xlu2 %v1697_v10, %s1898_s16 }
 0x19c   : > { %507 = vrot.lane.b32.xlu0 %v1697_v10, %s1897_s15 }
 0x1a4   : > { %585 = vperm.xlu0 %1693, %v582_v24  }
 0x1cd   : > { %v572_v11 = vpop.permute.xlu2 %571 }
 0x1d5   : > { %v556_v12 = vpop.permute.xlu2 %555 }
 0x1d6   : > { %v560_v23 = vsel %vm423_vm6, %v556_v12, 0.0 }
 0x1d7   : > { %v562_v25 = vmul.f32 %v2085_v8, %v560_v23 }
 0x1dd   : > { %v544_v14 = vpop.permute.xlu2 %543 }
 0x1e5   : > { %v554_v13 = vpop.permute.xlu1 %553  ;;  %v536_v28 = vpop.permute.xlu2 %535 }
 0x1e6   : > { %v557_v27 = vsel %vm423_vm6, %v554_v13, %v556_v12 }
 0x1e7   : > { %v561_v31 = vmul.f32 %v2081_v6, %v557_v27 }
 0x1ed   : > { %v566_v15 = vpop.permute.xlu1 %565  ;;  %v506_v36 = vpop.permute.xlu2 %505 }
 0x1ee   : > { %v574_v18 = vpop.permute.xlu0 %573  ;;  %v512_v49 = vsel %vm370_vm13, 0.0, %v506_v36 }
 0x1ef   : > { %v575_v19 = vsel %vm443_vm5, %v572_v11, %v574_v18  ;;  %v578_v20 = vsel %vm443_vm5, %v574_v18, 0.0  ;;  %v513_v52 = vmul.f32 %v2081_v6, %v512_v49 }
 0x1f0   : > { %v579_v21 = vmul.f32 %v2083_v7, %v575_v19  ;;  %v580_v22 = vmul.f32 %v2087_v9, %v578_v20 }
 0x1f2   : > { %598 = vmatpush.msra.mxu2 %v579_v21  ;;  %618 = vmatpush.msra.mxu3 %v580_v22 }
 0x1f4   : > { %1527 = vmatpush.msk.msra.mxu3 %vm434_vm7, %v566_v15 }
 0x1f5   : > { %v534_v26 = vpop.permute.xlu1 %533  ;;  %v518_v50 = vpop.permute.xlu2 %517 }
 0x1f6   : > { %620 = vmatpush.msra.mxu3 %v562_v25  ;;  %v564_v29 = vpop.permute.xlu0 %563  ;;  %v540_v39 = vsel %vm401_vm9, 0.0, %v534_v26  ;;  %v537_v40 = vsel %vm401_vm9, %v534_v26, %v536_v28 }
 0x1f7   : > { %v567_v30 = vsel %vm434_vm7, %v564_v29, %v566_v15  ;;  %v541_v41 = vmul.f32 %v2081_v6, %v540_v39  ;;  %v542_v42 = vmul.f32 %v2085_v8, %v537_v40 }
 0x1f8   : > { %599 = vmatpush.msra.mxu2 %v567_v30 }
 0x1fa   : > { %600 = vmatpush.msra.mxu2 %v561_v31 }
 0x1fd   : > { %v526_v32 = vpop.permute.xlu1 %525 }
 0x1fe   : > { %v546_v33 = vpop.permute.xlu0 %545 }
 0x1ff   : > { %v547_v34 = vsel %vm412_vm8, %v544_v14, %v546_v33  ;;  %v550_v35 = vsel %vm412_vm8, %v546_v33, 0.0 }
 0x200   : > { %v551_v37 = vmul.f32 %v2083_v7, %v547_v34  ;;  %v552_v38 = vmul.f32 %v2087_v9, %v550_v35 }
 0x202   : > { %601 = vmatpush.msra.mxu2 %v551_v37  ;;  %621 = vmatpush.msra.mxu3 %v552_v38 }
 0x204   : > { %602 = vmatpush.msra.mxu2 %v1695_v4  ;;  %622 = vmatpush.msra.mxu3 %v1697_v10 }
 0x205   : > { %v516_v46 = vpop.permute.xlu1 %515 }
 0x206   : > { %603 = vmatpush.msra.mxu2 %v541_v41  ;;  %623 = vmatpush.msra.mxu3 %v542_v42  ;;  %v524_v43 = vpop.permute.xlu0 %523  ;;  %v519_v51 = vsel %vm381_vm11, %v516_v46, %v518_v50 }
 0x207   : > { %v530_v44 = vsel %vm390_vm10, 0.0, %v524_v43  ;;  %v527_v45 = vsel %vm390_vm10, %v524_v43, %v526_v32 }
 0x208   : > { %v531_v47 = vmul.f32 %v2083_v7, %v530_v44  ;;  %v532_v48 = vmul.f32 %v2087_v9, %v527_v45 }
 0x20a   : > { %604 = vmatpush.msra.mxu2 %v531_v47  ;;  %624 = vmatpush.msra.mxu3 %v532_v48 }
 0x20c   : > { %1525 = vmatpush.msk.msra.mxu2 %vm2158_vm12, %v516_v46  ;;  %625 = vmatpush.msra.mxu3 %v519_v51 }
 0x20e   : > { %606 = vmatpush.msra.mxu2 %v513_v52  ;;  %v508_v55 = vpop.permute.xlu0 %507 }
 0x20f   : > { %1526 = vmatmul.msk.f32.vlgmr.msra.gmra.mxu2 %vm457_vm14, %v2231_v53  ;;  %v509_v56 = vsel %vm370_vm13, %v506_v36, %v508_v55 }
 0x210   : > { %v514_v57 = vmul.f32 %v2085_v8, %v509_v56 }
 0x212   : > { %626 = vmatpush.msra.mxu3 %v514_v57 }
 0x213   : > { %1528 = vmatmul.msk.f32.vlgmr.msra.gmra.mxu3 %vm457_vm14, %v2231_v53 }
 0x216   : > { %v2244_v59 = vpop.permute.xlu0 %585 }
 0x292   : > { %v608_v60 = vpop.f32.mrf.mxu2 }
 0x293   : > { %v2249_v62 = vadd.f32 %v608_v60, %v2244_v59 }
 0x295   : > { %v633_v63 = vmul.f32 %v2246_v61, %v2249_v62 }
 0x296   : > { %v628_v1 = vpop.f32.mrf.mxu3 }
 0x297   : > { %v2254_v2 = vadd.f32 %v628_v1, %v2244_v59  ;;  %v635_v3 = vadd.f32 %v633_v63, %v2094_v16 }
 0x299   : > { %v634_v4 = vmul.f32 %v2246_v61, %v2254_v2  ;;  %697 = vrot.lane.b32.xlu0 %v635_v3, %s1893_s13  ;;  %705 = vrot.lane.b32.xlu1 %v635_v3, %s1892_s12 }
 0x29b   : > { %v636_v5 = vadd.f32 %v634_v4, %v2102_v17 }
 0x29d   : > { %707 = vrot.lane.b32.xlu2 %v636_v5, %s1892_s12 }
 0x2a1   : > { %679 = vrot.lane.b32.xlu0 %v636_v5, %s1894_s18  ;;  %687 = vrot.lane.b32.xlu1 %v635_v3, %s1891_s11 }
 0x2a5   : > { %689 = vrot.lane.b32.xlu2 %v636_v5, %s1891_s11 }
 0x2a9   : > { %657 = vrot.lane.b32.xlu0 %v635_v3, %s1896_s8  ;;  %699 = vrot.lane.b32.xlu1 %v636_v5, %s1893_s13 }
 0x2ad   : > { %677 = vrot.lane.b32.xlu2 %v635_v3, %s1894_s18 }
 0x2b1   : > { %641 = vrot.lane.b32.xlu0 %v636_v5, %s1897_s15  ;;  %667 = vrot.lane.b32.xlu1 %v635_v3, %s1895_s19 }
 0x2b5   : > { %669 = vrot.lane.b32.xlu2 %v636_v5, %s1895_s19 }
 0x2b9   : > { %659 = vrot.lane.b32.xlu1 %v636_v5, %s1896_s8 }
 0x2bd   : > { %639 = vrot.lane.b32.xlu2 %v635_v3, %s1897_s15 }
 0x2c1   : > { %649 = vrot.lane.b32.xlu1 %v635_v3, %s1898_s16 }
 0x2c5   : > { %651 = vrot.lane.b32.xlu2 %v636_v5, %s1898_s16 }
 0x2f7   : > { %v708_v10 = vpop.permute.xlu2 %707 }
 0x2f8   : > { %v712_v11 = vsel %vm443_vm5, %v708_v10, 0.0 }
 0x2f9   : > { %v714_v12 = vmul.f32 %v2087_v9, %v712_v11 }
 0x2fb   : > { %742 = vmatpush.msrb.mxu1 %v714_v12 }
 0x2ff   : > { %v690_v13 = vpop.permute.xlu2 %689 }
 0x300   : > { %v694_v23 = vsel %vm423_vm6, %v690_v13, 0.0 }
 0x301   : > { %v696_v28 = vmul.f32 %v2085_v8, %v694_v23 }
 0x307   : > { %v678_v21 = vpop.permute.xlu2 %677 }
 0x30b   : > { %v706_v14 = vpop.permute.xlu1 %705  ;;  %v698_v18 = vpop.permute.xlu0 %697 }
 0x30c   : > { %v709_v15 = vsel %vm443_vm5, %v706_v14, %v708_v10 }
 0x30d   : > { %v713_v19 = vmul.f32 %v2083_v7, %v709_v15 }
 0x30f   : > { %722 = vmatpush.msrb.mxu0 %v713_v19  ;;  %v670_v32 = vpop.permute.xlu2 %669 }
 0x313   : > { %v688_v20 = vpop.permute.xlu1 %687  ;;  %v680_v22 = vpop.permute.xlu0 %679 }
 0x314   : > { %v691_v24 = vsel %vm423_vm6, %v688_v20, %v690_v13  ;;  %v684_v26 = vsel %vm412_vm8, %v680_v22, 0.0  ;;  %v681_v29 = vsel %vm412_vm8, %v678_v21, %v680_v22 }
 0x315   : > { %v695_v30 = vmul.f32 %v2081_v6, %v691_v24  ;;  %v686_v31 = vmul.f32 %v2087_v9, %v684_v26  ;;  %v685_v33 = vmul.f32 %v2083_v7, %v681_v29 }
 0x317   : > { %v640_v42 = vpop.permute.xlu2 %639 }
 0x318   : > { %v646_v47 = vsel %vm370_vm13, 0.0, %v640_v42 }
 0x319   : > { %v647_v52 = vmul.f32 %v2081_v6, %v646_v47 }
 0x31b   : > { %v700_v25 = vpop.permute.xlu1 %699  ;;  %v658_v34 = vpop.permute.xlu0 %657 }
 0x31c   : > { %1532 = vmatpush.msk.msrb.mxu1 %vm434_vm7, %v700_v25  ;;  %v701_v27 = vsel %vm434_vm7, %v698_v18, %v700_v25  ;;  %v664_v38 = vsel %vm390_vm10, 0.0, %v658_v34 }
 0x31d   : > { %723 = vmatpush.msrb.mxu0 %v701_v27  ;;  %v665_v41 = vmul.f32 %v2083_v7, %v664_v38 }
 0x31e   : > { %744 = vmatpush.msrb.mxu1 %v696_v28 }
 0x31f   : > { %724 = vmatpush.msrb.mxu0 %v695_v30  ;;  %v652_v49 = vpop.permute.xlu2 %651 }
 0x320   : > { %745 = vmatpush.msrb.mxu1 %v686_v31 }
 0x321   : > { %725 = vmatpush.msrb.mxu0 %v685_v33 }
 0x322   : > { %746 = vmatpush.msrb.mxu1 %v636_v5 }
 0x323   : > { %726 = vmatpush.msrb.mxu0 %v635_v3  ;;  %v668_v35 = vpop.permute.xlu1 %667  ;;  %v642_v46 = vpop.permute.xlu0 %641 }
 0x324   : > { %v674_v36 = vsel %vm401_vm9, 0.0, %v668_v35  ;;  %v671_v37 = vsel %vm401_vm9, %v668_v35, %v670_v32  ;;  %v643_v48 = vsel %vm370_vm13, %v640_v42, %v642_v46 }
 0x325   : > { %v675_v39 = vmul.f32 %v2081_v6, %v674_v36  ;;  %v676_v40 = vmul.f32 %v2085_v8, %v671_v37  ;;  %v648_v55 = vmul.f32 %v2085_v8, %v643_v48 }
 0x327   : > { %727 = vmatpush.msrb.mxu0 %v675_v39  ;;  %747 = vmatpush.msrb.mxu1 %v676_v40 }
 0x329   : > { %728 = vmatpush.msrb.mxu0 %v665_v41 }
 0x32b   : > { %v660_v43 = vpop.permute.xlu1 %659 }
 0x32c   : > { %v661_v44 = vsel %vm390_vm10, %v658_v34, %v660_v43 }
 0x32d   : > { %v666_v45 = vmul.f32 %v2087_v9, %v661_v44 }
 0x32f   : > { %748 = vmatpush.msrb.mxu1 %v666_v45 }
 0x333   : > { %v650_v50 = vpop.permute.xlu1 %649 }
 0x334   : > { %1530 = vmatpush.msk.msrb.mxu0 %vm2158_vm12, %v650_v50  ;;  %v653_v51 = vsel %vm381_vm11, %v650_v50, %v652_v49 }
 0x335   : > { %749 = vmatpush.msrb.mxu1 %v653_v51 }
 0x336   : > { %730 = vmatpush.msrb.mxu0 %v647_v52 }
 0x337   : > { %1531 = vmatmul.msk.f32.vlgmr.msrb.gmra.mxu0 %vm457_vm14, %v2169_v58  ;;  %750 = vmatpush.msrb.mxu1 %v648_v55 }
 0x338   : > { %1533 = vmatmul.msk.f32.vlgmr.msrb.gmra.mxu1 %vm457_vm14, %v2169_v58 }
 0x3b4   : > { %v732_v56 = vpop.f32.mrf.mxu0 }
 0x3b5   : > { %v733_v57 = vadd.f32 %v732_v56, %v2178_v0  ;;  %v752_v60 = vpop.f32.mrf.mxu1 }
 0x3b6   : > { %v753_v63 = vadd.f32 %v752_v60, %v2178_v0 }
 0x3b7   : > { %1698 = vtanh.f32 %v733_v57 }
 0x3b8   : > { %1700 = vtanh.f32 %v753_v63 }
 0x3bd   : > { %v1699_v1 = vpop.eup %1698 }
 0x3be   : > { %v1701_v3 = vpop.eup %1700  ;;  %807 = vrot.lane.b32.xlu2 %v1699_v1, %s1891_s11  ;;  %825 = vrot.lane.b32.xlu0 %v1699_v1, %s1892_s12 }
 0x3bf   : > { %827 = vrot.lane.b32.xlu1 %v1701_v3, %s1892_s12 }
 0x3c6   : > { %819 = vrot.lane.b32.xlu2 %v1701_v3, %s1893_s13  ;;  %809 = vrot.lane.b32.xlu0 %v1701_v3, %s1891_s11 }
 0x3c7   : > { %817 = vrot.lane.b32.xlu1 %v1699_v1, %s1893_s13 }
 0x3ce   : > { %787 = vrot.lane.b32.xlu2 %v1699_v1, %s1895_s19  ;;  %797 = vrot.lane.b32.xlu0 %v1699_v1, %s1894_s18 }
 0x3cf   : > { %799 = vrot.lane.b32.xlu1 %v1701_v3, %s1894_s18 }
 0x3d6   : > { %779 = vrot.lane.b32.xlu2 %v1701_v3, %s1896_s8  ;;  %789 = vrot.lane.b32.xlu0 %v1701_v3, %s1895_s19 }
 0x3d7   : > { %777 = vrot.lane.b32.xlu1 %v1699_v1, %s1896_s8 }
 0x3de   : > { %769 = vrot.lane.b32.xlu2 %v1699_v1, %s1898_s16  ;;  %759 = vrot.lane.b32.xlu0 %v1699_v1, %s1897_s15 }
 0x3df   : > { %761 = vrot.lane.b32.xlu1 %v1701_v3, %s1897_s15 }
 0x3e6   : > { %771 = vrot.lane.b32.xlu0 %v1701_v3, %s1898_s16 }
 0x418   : > { %v808_v4 = vpop.permute.xlu2 %807 }
 0x420   : > { %v820_v5 = vpop.permute.xlu2 %819 }
 0x428   : > { %v788_v22 = vpop.permute.xlu2 %787 }
 0x429   : > { %v794_v33 = vsel %vm401_vm9, 0.0, %v788_v22 }
 0x42a   : > { %v795_v34 = vmul.f32 %v2081_v6, %v794_v33 }
 0x430   : > { %v826_v10 = vpop.permute.xlu0 %825  ;;  %v780_v32 = vpop.permute.xlu2 %779 }
 0x431   : > { %v828_v11 = vpop.permute.xlu1 %827 }
 0x432   : > { %v829_v12 = vsel %vm443_vm5, %v826_v10, %v828_v11  ;;  %v832_v13 = vsel %vm443_vm5, %v828_v11, 0.0 }
 0x433   : > { %v833_v14 = vmul.f32 %v2083_v7, %v829_v12  ;;  %v834_v15 = vmul.f32 %v2087_v9, %v832_v13 }
 0x435   : > { %842 = vmatpush.msrb.mxu2 %v833_v14  ;;  %862 = vmatpush.msrb.mxu3 %v834_v15 }
 0x437   : > { %1537 = vmatpush.msk.msrb.mxu3 %vm434_vm7, %v820_v5 }
 0x438   : > { %v810_v18 = vpop.permute.xlu0 %809  ;;  %v770_v43 = vpop.permute.xlu2 %769 }
 0x439   : > { %v818_v19 = vpop.permute.xlu1 %817  ;;  %v814_v20 = vsel %vm423_vm6, %v810_v18, 0.0  ;;  %v811_v21 = vsel %vm423_vm6, %v808_v4, %v810_v18 }
 0x43a   : > { %v821_v23 = vsel %vm434_vm7, %v818_v19, %v820_v5  ;;  %v816_v24 = vmul.f32 %v2085_v8, %v814_v20  ;;  %v815_v25 = vmul.f32 %v2081_v6, %v811_v21 }
 0x43b   : > { %843 = vmatpush.msrb.mxu2 %v821_v23 }
 0x43c   : > { %864 = vmatpush.msrb.mxu3 %v816_v24 }
 0x43d   : > { %844 = vmatpush.msrb.mxu2 %v815_v25 }
 0x440   : > { %v798_v26 = vpop.permute.xlu0 %797 }
 0x441   : > { %v800_v27 = vpop.permute.xlu1 %799 }
 0x442   : > { %v801_v28 = vsel %vm412_vm8, %v798_v26, %v800_v27  ;;  %v804_v29 = vsel %vm412_vm8, %v800_v27, 0.0 }
 0x443   : > { %v805_v30 = vmul.f32 %v2083_v7, %v801_v28  ;;  %v806_v31 = vmul.f32 %v2087_v9, %v804_v29 }
 0x445   : > { %845 = vmatpush.msrb.mxu2 %v805_v30  ;;  %865 = vmatpush.msrb.mxu3 %v806_v31 }
 0x447   : > { %846 = vmatpush.msrb.mxu2 %v1699_v1  ;;  %866 = vmatpush.msrb.mxu3 %v1701_v3 }
 0x448   : > { %v790_v35 = vpop.permute.xlu0 %789 }
 0x449   : > { %847 = vmatpush.msrb.mxu2 %v795_v34  ;;  %v778_v36 = vpop.permute.xlu1 %777  ;;  %v791_v37 = vsel %vm401_vm9, %v788_v22, %v790_v35 }
 0x44a   : > { %v796_v38 = vmul.f32 %v2085_v8, %v791_v37  ;;  %v784_v39 = vsel %vm390_vm10, 0.0, %v778_v36  ;;  %v781_v40 = vsel %vm390_vm10, %v778_v36, %v780_v32 }
 0x44b   : > { %v785_v41 = vmul.f32 %v2083_v7, %v784_v39  ;;  %v786_v42 = vmul.f32 %v2087_v9, %v781_v40 }
 0x44c   : > { %867 = vmatpush.msrb.mxu3 %v796_v38 }
 0x44d   : > { %848 = vmatpush.msrb.mxu2 %v785_v41 }
 0x44e   : > { %868 = vmatpush.msrb.mxu3 %v786_v42 }
 0x44f   : > { %1535 = vmatpush.msk.msrb.mxu2 %vm2158_vm12, %v770_v43 }
 0x450   : > { %v760_v44 = vpop.permute.xlu0 %759 }
 0x451   : > { %v766_v45 = vsel %vm370_vm13, 0.0, %v760_v44  ;;  %v762_v47 = vpop.permute.xlu1 %761 }
 0x452   : > { %v767_v46 = vmul.f32 %v2081_v6, %v766_v45  ;;  %v763_v48 = vsel %vm370_vm13, %v760_v44, %v762_v47 }
 0x453   : > { %v768_v51 = vmul.f32 %v2085_v8, %v763_v48 }
 0x454   : > { %850 = vmatpush.msrb.mxu2 %v767_v46 }
 0x455   : > { %1536 = vmatmul.msk.f32.vlgmr.msrb.gmra.mxu2 %vm457_vm14, %v2231_v53 }
 0x458   : > { %v772_v49 = vpop.permute.xlu0 %771 }
 0x459   : > { %v773_v50 = vsel %vm381_vm11, %v770_v43, %v772_v49 }
 0x45a   : > { %869 = vmatpush.msrb.mxu3 %v773_v50 }
 0x45c   : > { %870 = vmatpush.msrb.mxu3 %v768_v51 }
 0x45d   : > { %1538 = vmatmul.msk.f32.vlgmr.msrb.gmra.mxu3 %vm457_vm14, %v2231_v53 }
 0x4d8   : > { %v852_v52 = vpop.f32.mrf.mxu2 }
 0x4d9   : > { %v2361_v55 = vadd.f32 %v852_v52, %v2244_v59 }
 0x4db   : > { %v875_v56 = vmul.f32 %v2361_v55, %v2246_v61 }
 0x4dd   : > { %v877_v57 = vadd.f32 %v875_v56, %v2094_v16 }
 0x4df   : > { %929 = vrot.lane.b32.xlu0 %v877_v57, %s1891_s11  ;;  %947 = vrot.lane.b32.xlu1 %v877_v57, %s1892_s12 }
 0x4e0   : > { %v872_v60 = vpop.f32.mrf.mxu3 }
 0x4e1   : > { %v2369_v63 = vadd.f32 %v872_v60, %v2244_v59 }
 0x4e3   : > { %v876_v1 = vmul.f32 %v2369_v63, %v2246_v61 }
 0x4e5   : > { %v878_v3 = vadd.f32 %v876_v1, %v2102_v17 }
 0x4e7   : > { %941 = vrot.lane.b32.xlu0 %v878_v3, %s1893_s13  ;;  %931 = vrot.lane.b32.xlu1 %v878_v3, %s1891_s11 }
 0x4e8   : > { %949 = vrot.lane.b32.xlu2 %v878_v3, %s1892_s12 }
 0x4ef   : > { %909 = vrot.lane.b32.xlu0 %v877_v57, %s1895_s19  ;;  %919 = vrot.lane.b32.xlu1 %v877_v57, %s1894_s18 }
 0x4f0   : > { %939 = vrot.lane.b32.xlu2 %v877_v57, %s1893_s13 }
 0x4f7   : > { %901 = vrot.lane.b32.xlu0 %v878_v3, %s1896_s8  ;;  %911 = vrot.lane.b32.xlu1 %v878_v3, %s1895_s19 }
 0x4f8   : > { %921 = vrot.lane.b32.xlu2 %v878_v3, %s1894_s18 }
 0x4ff   : > { %891 = vrot.lane.b32.xlu0 %v877_v57, %s1898_s16  ;;  %881 = vrot.lane.b32.xlu1 %v877_v57, %s1897_s15 }
 0x500   : > { %899 = vrot.lane.b32.xlu2 %v877_v57, %s1896_s8 }
 0x507   : > { %893 = vrot.lane.b32.xlu1 %v878_v3, %s1898_s16 }
 0x508   : > { %883 = vrot.lane.b32.xlu2 %v878_v3, %s1897_s15 }
 0x542   : > { %v950_v16 = vpop.permute.xlu2 %949 }
 0x543   : > { %v954_v17 = vsel %vm443_vm5, %v950_v16, 0.0 }
 0x544   : > { %v956_v61 = vmul.f32 %v2087_v9, %v954_v17 }
 0x546   : > { %984 = vmatpush.msra.mxu1 %v956_v61 }
 0x54a   : > { %v940_v4 = vpop.permute.xlu2 %939 }
 0x551   : > { %v930_v5 = vpop.permute.xlu0 %929  ;;  %v948_v10 = vpop.permute.xlu1 %947 }
 0x552   : > { %v951_v11 = vsel %vm443_vm5, %v948_v10, %v950_v16  ;;  %v922_v13 = vpop.permute.xlu2 %921 }
 0x553   : > { %v955_v12 = vmul.f32 %v2083_v7, %v951_v11  ;;  %v926_v18 = vsel %vm412_vm8, %v922_v13, 0.0 }
 0x554   : > { %v928_v24 = vmul.f32 %v2087_v9, %v926_v18 }
 0x555   : > { %964 = vmatpush.msra.mxu0 %v955_v12 }
 0x559   : > { %v942_v14 = vpop.permute.xlu0 %941  ;;  %v932_v15 = vpop.permute.xlu1 %931 }
 0x55a   : > { %v933_v19 = vsel %vm423_vm6, %v930_v5, %v932_v15  ;;  %v936_v20 = vsel %vm423_vm6, %v932_v15, 0.0  ;;  %1542 = vmatpush.msk.msra.mxu1 %vm434_vm7, %v942_v14  ;;  %v943_v21 = vsel %vm434_vm7, %v940_v4, %v942_v14  ;;  %v900_v28 = vpop.permute.xlu2 %899 }
 0x55b   : > { %v937_v22 = vmul.f32 %v2081_v6, %v933_v19  ;;  %v938_v23 = vmul.f32 %v2085_v8, %v936_v20  ;;  %965 = vmatpush.msra.mxu0 %v943_v21  ;;  %v906_v31 = vsel %vm390_vm10, 0.0, %v900_v28 }
 0x55c   : > { %v907_v33 = vmul.f32 %v2083_v7, %v906_v31 }
 0x55d   : > { %966 = vmatpush.msra.mxu0 %v937_v22  ;;  %986 = vmatpush.msra.mxu1 %v938_v23 }
 0x55f   : > { %987 = vmatpush.msra.mxu1 %v928_v24 }
 0x561   : > { %v910_v25 = vpop.permute.xlu0 %909  ;;  %988 = vmatpush.msra.mxu1 %v878_v3  ;;  %v920_v26 = vpop.permute.xlu1 %919 }
 0x562   : > { %v923_v27 = vsel %vm412_vm8, %v920_v26, %v922_v13  ;;  %v916_v30 = vsel %vm401_vm9, 0.0, %v910_v25  ;;  %v884_v44 = vpop.permute.xlu2 %883 }
 0x563   : > { %v927_v29 = vmul.f32 %v2083_v7, %v923_v27  ;;  %v917_v32 = vmul.f32 %v2081_v6, %v916_v30 }
 0x565   : > { %967 = vmatpush.msra.mxu0 %v927_v29 }
 0x567   : > { %968 = vmatpush.msra.mxu0 %v877_v57 }
 0x569   : > { %v902_v34 = vpop.permute.xlu0 %901  ;;  %969 = vmatpush.msra.mxu0 %v917_v32  ;;  %v912_v35 = vpop.permute.xlu1 %911 }
 0x56a   : > { %v903_v36 = vsel %vm390_vm10, %v900_v28, %v902_v34  ;;  %v913_v37 = vsel %vm401_vm9, %v910_v25, %v912_v35 }
 0x56b   : > { %v918_v38 = vmul.f32 %v2085_v8, %v913_v37  ;;  %970 = vmatpush.msra.mxu0 %v907_v33  ;;  %v908_v39 = vmul.f32 %v2087_v9, %v903_v36 }
 0x56d   : > { %989 = vmatpush.msra.mxu1 %v918_v38 }
 0x56f   : > { %990 = vmatpush.msra.mxu1 %v908_v39 }
 0x571   : > { %v892_v40 = vpop.permute.xlu0 %891  ;;  %v882_v41 = vpop.permute.xlu1 %881 }
 0x572   : > { %v888_v42 = vsel %vm370_vm13, 0.0, %v882_v41  ;;  %1540 = vmatpush.msk.msra.mxu0 %vm2158_vm12, %v892_v40  ;;  %v885_v45 = vsel %vm370_vm13, %v882_v41, %v884_v44 }
 0x573   : > { %v889_v43 = vmul.f32 %v2081_v6, %v888_v42  ;;  %v890_v48 = vmul.f32 %v2085_v8, %v885_v45  ;;  %v1369_v45 = vmul.f32 2.0, %v2361_v55 }
 0x575   : > { %972 = vmatpush.msra.mxu0 %v889_v43 }
 0x576   : > { %1541 = vmatmul.msk.f32.vlgmr.msra.gmra.mxu0 %vm457_vm14, %v2169_v58 }
 0x579   : > { %v894_v46 = vpop.permute.xlu1 %893 }
 0x57a   : > { %v895_v47 = vsel %vm381_vm11, %v892_v40, %v894_v46 }
 0x57b   : > { %991 = vmatpush.msra.mxu1 %v895_v47  ;;  %v1117_v47 = vstv %s2241_s28 }
 0x57d   : > { %992 = vmatpush.msra.mxu1 %v890_v48 }
 0x57e   : > { %1543 = vmatmul.msk.f32.vlgmr.msra.gmra.mxu1 %vm457_vm14, %v2169_v58 }
 0x5f3   : > { %v974_v49 = vpop.f32.mrf.mxu0 }
 0x5f4   : > { %v975_v50 = vadd.f32 %v974_v49, %v2178_v0  ;;  %v1371_v49 = vadd.f32 %v1369_v45, %v2249_v62  ;;  %v2486_v62 = vld [vmem:[#allocation2 + $0x8] sm:$0xff]  ;;  %v1714_v45 = vld [vmem:[%s2656_s2] sm:$0xff] }
 0x5f6   : > { %1702 = vtanh.f32 %v975_v50  ;;  %v1370_v50 = vmul.f32 2.0, %v2369_v63 }
 0x5f8   : > { %v1372_v55 = vadd.f32 %v1370_v50, %v2254_v2 }
 0x5fb   : > { %v994_v51 = vpop.f32.mrf.mxu1 }
 0x5fc   : > { %v1703_v52 = vpop.eup %1702  ;;  %v995_v56 = vadd.f32 %v994_v51, %v2178_v0 }
 0x5fd   : > { %1049 = vrot.lane.b32.xlu1 %v1703_v52, %s1891_s11  ;;  %1067 = vrot.lane.b32.xlu2 %v1703_v52, %s1892_s12 }
 0x5fe   : > { %1704 = vtanh.f32 %v995_v56 }
 0x604   : > { %v1705_v57 = vpop.eup %1704 }
 0x605   : > { %1061 = vrot.lane.b32.xlu1 %v1705_v57, %s1893_s13  ;;  %1051 = vrot.lane.b32.xlu2 %v1705_v57, %s1891_s11 }
 0x606   : > { %1069 = vrot.lane.b32.xlu0 %v1705_v57, %s1892_s12 }
 0x60d   : > { %1029 = vrot.lane.b32.xlu1 %v1703_v52, %s1895_s19  ;;  %1039 = vrot.lane.b32.xlu2 %v1703_v52, %s1894_s18 }
 0x60e   : > { %1059 = vrot.lane.b32.xlu0 %v1703_v52, %s1893_s13 }
 0x615   : > { %1021 = vrot.lane.b32.xlu1 %v1705_v57, %s1896_s8  ;;  %1031 = vrot.lane.b32.xlu2 %v1705_v57, %s1895_s19 }
 0x616   : > { %1041 = vrot.lane.b32.xlu0 %v1705_v57, %s1894_s18 }
 0x61d   : > { %1011 = vrot.lane.b32.xlu1 %v1703_v52, %s1898_s16  ;;  %1001 = vrot.lane.b32.xlu2 %v1703_v52, %s1897_s15 }
 0x61e   : > { %1019 = vrot.lane.b32.xlu0 %v1703_v52, %s1896_s8 }
 0x625   : > { %1013 = vrot.lane.b32.xlu2 %v1705_v57, %s1898_s16 }
 0x626   : > { %1003 = vrot.lane.b32.xlu0 %v1705_v57, %s1897_s15 }
 0x657   : > { %v1068_v58 = vpop.permute.xlu2 %1067 }
 0x65f   : > { %v1052_v60 = vpop.permute.xlu2 %1051 }
 0x660   : > { %v1056_v11 = vsel %vm423_vm6, %v1052_v60, 0.0 }
 0x661   : > { %v1058_v12 = vmul.f32 %v2085_v8, %v1056_v11 }
 0x667   : > { %v1040_v3 = vpop.permute.xlu2 %1039 }
 0x66f   : > { %v1050_v1 = vpop.permute.xlu1 %1049  ;;  %v1032_v15 = vpop.permute.xlu2 %1031 }
 0x670   : > { %v1053_v13 = vsel %vm423_vm6, %v1050_v1, %v1052_v60 }
 0x671   : > { %v1057_v20 = vmul.f32 %v2081_v6, %v1053_v13 }
 0x677   : > { %v1062_v16 = vpop.permute.xlu1 %1061  ;;  %v1002_v25 = vpop.permute.xlu2 %1001 }
 0x678   : > { %v1070_v17 = vpop.permute.xlu0 %1069  ;;  %v1008_v38 = vsel %vm370_vm13, 0.0, %v1002_v25 }
 0x679   : > { %v1071_v61 = vsel %vm443_vm5, %v1068_v58, %v1070_v17  ;;  %v1074_v4 = vsel %vm443_vm5, %v1070_v17, 0.0  ;;  %v1009_v41 = vmul.f32 %v2081_v6, %v1008_v38 }
 0x67a   : > { %v1075_v5 = vmul.f32 %v2083_v7, %v1071_v61  ;;  %v1076_v10 = vmul.f32 %v2087_v9, %v1074_v4 }
 0x67c   : > { %1084 = vmatpush.msra.mxu2 %v1075_v5  ;;  %1104 = vmatpush.msra.mxu3 %v1076_v10 }
 0x67e   : > { %1547 = vmatpush.msk.msra.mxu3 %vm434_vm7, %v1062_v16 }
 0x67f   : > { %v1030_v14 = vpop.permute.xlu1 %1029  ;;  %v1014_v39 = vpop.permute.xlu2 %1013 }
 0x680   : > { %v1060_v18 = vpop.permute.xlu0 %1059  ;;  %1106 = vmatpush.msra.mxu3 %v1058_v12  ;;  %v1033_v28 = vsel %vm401_vm9, %v1030_v14, %v1032_v15  ;;  %v1036_v29 = vsel %vm401_vm9, 0.0, %v1030_v14 }
 0x681   : > { %v1063_v19 = vsel %vm434_vm7, %v1060_v18, %v1062_v16  ;;  %v1037_v30 = vmul.f32 %v2081_v6, %v1036_v29  ;;  %v1038_v31 = vmul.f32 %v2085_v8, %v1033_v28 }
 0x682   : > { %1085 = vmatpush.msra.mxu2 %v1063_v19 }
 0x684   : > { %1086 = vmatpush.msra.mxu2 %v1057_v20 }
 0x687   : > { %v1022_v22 = vpop.permute.xlu1 %1021 }
 0x688   : > { %v1042_v21 = vpop.permute.xlu0 %1041 }
 0x689   : > { %v1043_v23 = vsel %vm412_vm8, %v1040_v3, %v1042_v21  ;;  %v1046_v24 = vsel %vm412_vm8, %v1042_v21, 0.0 }
 0x68a   : > { %v1047_v26 = vmul.f32 %v2083_v7, %v1043_v23  ;;  %v1048_v27 = vmul.f32 %v2087_v9, %v1046_v24 }
 0x68c   : > { %1087 = vmatpush.msra.mxu2 %v1047_v26  ;;  %1107 = vmatpush.msra.mxu3 %v1048_v27 }
 0x68e   : > { %1088 = vmatpush.msra.mxu2 %v1703_v52  ;;  %1108 = vmatpush.msra.mxu3 %v1705_v57  ;;  %v2477_v57 = vld [vmem:[#allocation2] sm:$0xff] }
 0x68f   : > { %v1012_v37 = vpop.permute.xlu1 %1011 }
 0x690   : > { %v1020_v32 = vpop.permute.xlu0 %1019  ;;  %1089 = vmatpush.msra.mxu2 %v1037_v30  ;;  %1109 = vmatpush.msra.mxu3 %v1038_v31  ;;  %v1015_v40 = vsel %vm381_vm11, %v1012_v37, %v1014_v39 }
 0x691   : > { %v1023_v33 = vsel %vm390_vm10, %v1020_v32, %v1022_v22  ;;  %v1026_v34 = vsel %vm390_vm10, 0.0, %v1020_v32 }
 0x692   : > { %v1027_v35 = vmul.f32 %v2083_v7, %v1026_v34  ;;  %v1028_v36 = vmul.f32 %v2087_v9, %v1023_v33 }
 0x694   : > { %1090 = vmatpush.msra.mxu2 %v1027_v35  ;;  %1110 = vmatpush.msra.mxu3 %v1028_v36 }
 0x696   : > { %1545 = vmatpush.msk.msra.mxu2 %vm2158_vm12, %v1012_v37  ;;  %1111 = vmatpush.msra.mxu3 %v1015_v40 }
 0x698   : > { %v1004_v42 = vpop.permute.xlu0 %1003  ;;  %1092 = vmatpush.msra.mxu2 %v1009_v41 }
 0x699   : > { %v1005_v43 = vsel %vm370_vm13, %v1002_v25, %v1004_v42  ;;  %1546 = vmatmul.msk.f32.vlgmr.msra.gmra.mxu2 %vm457_vm14, %v2231_v53 }
 0x69a   : > { %v1010_v44 = vmul.f32 %v2085_v8, %v1005_v43 }
 0x69c   : > { %1112 = vmatpush.msra.mxu3 %v1010_v44 }
 0x69d   : > { %1548 = vmatmul.msk.f32.vlgmr.msra.gmra.mxu3 %vm457_vm14, %v2231_v53 }
 0x71c   : > { %v1094_v46 = vpop.f32.mrf.mxu2 }
 0x71d   : > { %v1095_v48 = vadd.f32 %v1094_v46, %v2244_v59 }
 0x71f   : > { %v1118_v51 = vmul.f32 %v1117_v47, %v1095_v48  ;;  %v1373_v52 = vmul.f32 2.0, %v1095_v48 }
 0x720   : > { %v1114_v56 = vpop.f32.mrf.mxu3 }
 0x721   : > { %v1120_v58 = vadd.f32 %v2477_v57, %v1118_v51  ;;  %v1115_v60 = vadd.f32 %v1114_v56, %v2244_v59  ;;  %v2481_v53 = vadd.f32 %v1373_v52, %v1371_v49 }
 0x723   : > { %v1119_v1 = vmul.f32 %v1117_v47, %v1115_v60  ;;  %v1374_v3 = vmul.f32 2.0, %v1115_v60  ;;  %1172 = vrot.lane.b32.xlu2 %v1120_v58, %s1891_s11  ;;  %1190 = vrot.lane.b32.xlu0 %v1120_v58, %s1892_s12 }
 0x725   : > { %v1121_v63 = vadd.f32 %v2486_v62, %v1119_v1  ;;  %v2489_v16 = vadd.f32 %v1374_v3, %v1372_v55 }
 0x727   : > { %1192 = vrot.lane.b32.xlu1 %v1121_v63, %s1892_s12 }
 0x72b   : > { %1184 = vrot.lane.b32.xlu2 %v1121_v63, %s1893_s13  ;;  %1174 = vrot.lane.b32.xlu0 %v1121_v63, %s1891_s11 }
 0x72f   : > { %1182 = vrot.lane.b32.xlu1 %v1120_v58, %s1893_s13 }
 0x733   : > { %1152 = vrot.lane.b32.xlu2 %v1120_v58, %s1895_s19  ;;  %1162 = vrot.lane.b32.xlu0 %v1120_v58, %s1894_s18 }
 0x737   : > { %1164 = vrot.lane.b32.xlu1 %v1121_v63, %s1894_s18 }
 0x73b   : > { %1144 = vrot.lane.b32.xlu2 %v1121_v63, %s1896_s8  ;;  %1154 = vrot.lane.b32.xlu0 %v1121_v63, %s1895_s19 }
 0x73f   : > { %1142 = vrot.lane.b32.xlu1 %v1120_v58, %s1896_s8 }
 0x743   : > { %1134 = vrot.lane.b32.xlu2 %v1120_v58, %s1898_s16  ;;  %1124 = vrot.lane.b32.xlu0 %v1120_v58, %s1897_s15 }
 0x747   : > { %1126 = vrot.lane.b32.xlu1 %v1121_v63, %s1897_s15 }
 0x74b   : > { %1136 = vrot.lane.b32.xlu0 %v1121_v63, %s1898_s16 }
 0x77d   : > { %v1173_v2 = vpop.permute.xlu2 %1172 }
 0x785   : > { %v1185_v61 = vpop.permute.xlu2 %1184 }
 0x78d   : > { %v1153_v20 = vpop.permute.xlu2 %1152 }
 0x78e   : > { %v1159_v29 = vsel %vm401_vm9, 0.0, %v1153_v20 }
 0x78f   : > { %v1160_v33 = vmul.f32 %v2081_v6, %v1159_v29 }
 0x795   : > { %v1191_v17 = vpop.permute.xlu0 %1190  ;;  %v1145_v30 = vpop.permute.xlu2 %1144 }
 0x799   : > { %v1193_v4 = vpop.permute.xlu1 %1192 }
 0x79a   : > { %v1194_v5 = vsel %vm443_vm5, %v1191_v17, %v1193_v4  ;;  %v1197_v10 = vsel %vm443_vm5, %v1193_v4, 0.0 }
 0x79b   : > { %v1198_v11 = vmul.f32 %v2083_v7, %v1194_v5  ;;  %v1199_v12 = vmul.f32 %v2087_v9, %v1197_v10 }
 0x79d   : > { %v1175_v13 = vpop.permute.xlu0 %1174  ;;  %1207 = vmatpush.msrb.mxu0 %v1198_v11  ;;  %1227 = vmatpush.msrb.mxu1 %v1199_v12  ;;  %v1135_v41 = vpop.permute.xlu2 %1134 }
 0x79e   : > { %v1179_v14 = vsel %vm423_vm6, %v1175_v13, 0.0  ;;  %v1176_v18 = vsel %vm423_vm6, %v1173_v2, %v1175_v13 }
 0x79f   : > { %v1181_v15 = vmul.f32 %v2085_v8, %v1179_v14  ;;  %1552 = vmatpush.msk.msrb.mxu1 %vm434_vm7, %v1185_v61  ;;  %v1180_v22 = vmul.f32 %v2081_v6, %v1176_v18 }
 0x7a1   : > { %1229 = vmatpush.msrb.mxu1 %v1181_v15  ;;  %v1183_v19 = vpop.permute.xlu1 %1182 }
 0x7a2   : > { %v1186_v21 = vsel %vm434_vm7, %v1183_v19, %v1185_v61 }
 0x7a3   : > { %1208 = vmatpush.msrb.mxu0 %v1186_v21 }
 0x7a5   : > { %v1163_v23 = vpop.permute.xlu0 %1162  ;;  %1209 = vmatpush.msrb.mxu0 %v1180_v22 }
 0x7a9   : > { %v1165_v24 = vpop.permute.xlu1 %1164 }
 0x7aa   : > { %v1166_v25 = vsel %vm412_vm8, %v1163_v23, %v1165_v24  ;;  %v1169_v26 = vsel %vm412_vm8, %v1165_v24, 0.0 }
 0x7ab   : > { %v1170_v27 = vmul.f32 %v2083_v7, %v1166_v25  ;;  %v1171_v28 = vmul.f32 %v2087_v9, %v1169_v26 }
 0x7ad   : > { %v1155_v31 = vpop.permute.xlu0 %1154  ;;  %1210 = vmatpush.msrb.mxu0 %v1170_v27  ;;  %1230 = vmatpush.msrb.mxu1 %v1171_v28 }
 0x7ae   : > { %v1156_v32 = vsel %vm401_vm9, %v1153_v20, %v1155_v31  ;;  %v1900_v20 = vmov 6.0  }
 0x7af   : > { %v1161_v34 = vmul.f32 %v2085_v8, %v1156_v32  ;;  %1211 = vmatpush.msrb.mxu0 %v1120_v58  ;;  %1231 = vmatpush.msrb.mxu1 %v1121_v63 }
 0x7b1   : > { %1212 = vmatpush.msrb.mxu0 %v1160_v33  ;;  %1232 = vmatpush.msrb.mxu1 %v1161_v34  ;;  %v1143_v35 = vpop.permute.xlu1 %1142 }
 0x7b2   : > { %v1146_v36 = vsel %vm390_vm10, %v1143_v35, %v1145_v30  ;;  %v1149_v37 = vsel %vm390_vm10, 0.0, %v1143_v35 }
 0x7b3   : > { %v1150_v38 = vmul.f32 %v2083_v7, %v1149_v37  ;;  %v1151_v39 = vmul.f32 %v2087_v9, %v1146_v36 }
 0x7b5   : > { %v1125_v40 = vpop.permute.xlu0 %1124  ;;  %1213 = vmatpush.msrb.mxu0 %v1150_v38  ;;  %1233 = vmatpush.msrb.mxu1 %v1151_v39 }
 0x7b6   : > { %v1131_v42 = vsel %vm370_vm13, 0.0, %v1125_v40 }
 0x7b7   : > { %v1132_v43 = vmul.f32 %v2081_v6, %v1131_v42  ;;  %1550 = vmatpush.msk.msrb.mxu0 %vm2158_vm12, %v1135_v41 }
 0x7b9   : > { %1215 = vmatpush.msrb.mxu0 %v1132_v43  ;;  %v1127_v44 = vpop.permute.xlu1 %1126 }
 0x7ba   : > { %1551 = vmatmul.msk.f32.vlgmr.msrb.gmra.mxu0 %vm457_vm14, %v1714_v45  ;;  %v1128_v46 = vsel %vm370_vm13, %v1125_v40, %v1127_v44 }
 0x7bb   : > { %v1133_v49 = vmul.f32 %v2085_v8, %v1128_v46 }
 0x7bd   : > { %v1137_v47 = vpop.permute.xlu0 %1136 }
 0x7be   : > { %v1138_v48 = vsel %vm381_vm11, %v1135_v41, %v1137_v47 }
 0x7bf   : > { %1234 = vmatpush.msrb.mxu1 %v1138_v48 }
 0x7c1   : > { %1235 = vmatpush.msrb.mxu1 %v1133_v49 }
 0x7c2   : > { %1553 = vmatmul.msk.f32.vlgmr.msrb.gmra.mxu1 %vm457_vm14, %v1714_v45  ;;  %v1715_v45 = vld [vmem:[%s2692_s9] sm:$0xff] }
 0x837   : > { %v1217_v50 = vpop.f32.mrf.mxu0 }
 0x838   : > { %v1218_v51 = vadd.f32 %v1217_v50, %v2178_v0 }
 0x83a   : > { %1706 = vtanh.f32 %v1218_v51 }
 0x83f   : > { %v1237_v52 = vpop.f32.mrf.mxu1 }
 0x840   : > { %v1707_v56 = vpop.eup %1706  ;;  %v1238_v58 = vadd.f32 %v1237_v52, %v2178_v0 }
 0x841   : > { %1292 = vrot.lane.b32.xlu0 %v1707_v56, %s1891_s11  ;;  %1310 = vrot.lane.b32.xlu1 %v1707_v56, %s1892_s12 }
 0x842   : > { %1708 = vtanh.f32 %v1238_v58 }
 0x843   : > { %1710 = vrcp.f32 %v1900_v20 }
 0x848   : > { %v1709_v60 = vpop.eup %1708 }
 0x849   : > { %1304 = vrot.lane.b32.xlu0 %v1709_v60, %s1893_s13  ;;  %1294 = vrot.lane.b32.xlu1 %v1709_v60, %s1891_s11  ;;  %v1711_v27 = vpop.eup %1710 }
 0x84a   : > { %1312 = vrot.lane.b32.xlu2 %v1709_v60, %s1892_s12  ;;  %v1361_v29 = vmul.f32 6.0, %v1711_v27  ;;  %vm1365_vm15 = vweird.f32 %v1711_v27 }
 0x84c   : > { %v1362_v31 = vsub.f32 1.0, %v1361_v29 }
 0x84e   : > { %v1363_v37 = vmul.f32 %v1711_v27, %v1362_v31 }
 0x850   : > { %v1364_v39 = vadd.f32 %v1711_v27, %v1363_v37 }
 0x851   : > { %1272 = vrot.lane.b32.xlu0 %v1707_v56, %s1895_s19  ;;  %1282 = vrot.lane.b32.xlu1 %v1707_v56, %s1894_s18 }
 0x852   : > { %1302 = vrot.lane.b32.xlu2 %v1707_v56, %s1893_s13  ;;  %v1366_v41 = vsel %vm1365_vm15, %v1711_v27, %v1364_v39 }
 0x853   : > { %1566 = vpush %v1366_v41 }
 0x859   : > { %1264 = vrot.lane.b32.xlu0 %v1709_v60, %s1896_s8  ;;  %1274 = vrot.lane.b32.xlu1 %v1709_v60, %s1895_s19 }
 0x85a   : > { %1284 = vrot.lane.b32.xlu2 %v1709_v60, %s1894_s18 }
 0x861   : > { %1254 = vrot.lane.b32.xlu0 %v1707_v56, %s1898_s16  ;;  %1244 = vrot.lane.b32.xlu1 %v1707_v56, %s1897_s15 }
 0x862   : > { %1262 = vrot.lane.b32.xlu2 %v1707_v56, %s1896_s8 }
 0x869   : > { %1256 = vrot.lane.b32.xlu1 %v1709_v60, %s1898_s16 }
 0x86a   : > { %1246 = vrot.lane.b32.xlu2 %v1709_v60, %s1897_s15 }
 0x884   : > { %s1567_s13 = spop %1566 }
 0x885   : > { %s1368_s18 = smul.f32 %s1567_s13, %s2241_s28 }
 0x887   : > { %v1379_v50 = vstv %s1368_s18 }
 0x8a4   : > { %v1313_v0 = vpop.permute.xlu2 %1312 }
 0x8a5   : > { %v1317_v55 = vsel %vm443_vm5, %v1313_v0, 0.0 }
 0x8a6   : > { %v1319_v1 = vmul.f32 %v2087_v9, %v1317_v55 }
 0x8a8   : > { %1347 = vmatpush.msrb.mxu3 %v1319_v1 }
 0x8ac   : > { %v1303_v3 = vpop.permute.xlu2 %1302 }
 0x8b3   : > { %v1293_v63 = vpop.permute.xlu0 %1292  ;;  %v1311_v2 = vpop.permute.xlu1 %1310 }
 0x8b4   : > { %v1314_v17 = vsel %vm443_vm5, %v1311_v2, %v1313_v0  ;;  %v1285_v4 = vpop.permute.xlu2 %1284 }
 0x8b5   : > { %v1318_v61 = vmul.f32 %v2083_v7, %v1314_v17  ;;  %v1289_v11 = vsel %vm412_vm8, %v1285_v4, 0.0 }
 0x8b6   : > { %v1291_v19 = vmul.f32 %v2087_v9, %v1289_v11 }
 0x8b7   : > { %1327 = vmatpush.msrb.mxu2 %v1318_v61 }
 0x8bb   : > { %v1305_v5 = vpop.permute.xlu0 %1304  ;;  %v1295_v10 = vpop.permute.xlu1 %1294 }
 0x8bc   : > { %v1296_v12 = vsel %vm423_vm6, %v1293_v63, %v1295_v10  ;;  %v1299_v13 = vsel %vm423_vm6, %v1295_v10, 0.0  ;;  %1557 = vmatpush.msk.msrb.mxu3 %vm434_vm7, %v1305_v5  ;;  %v1306_v14 = vsel %vm434_vm7, %v1303_v3, %v1305_v5  ;;  %v1263_v24 = vpop.permute.xlu2 %1262 }
 0x8bd   : > { %v1300_v15 = vmul.f32 %v2081_v6, %v1296_v12  ;;  %v1301_v18 = vmul.f32 %v2085_v8, %v1299_v13  ;;  %1328 = vmatpush.msrb.mxu2 %v1306_v14  ;;  %v1269_v28 = vsel %vm390_vm10, 0.0, %v1263_v24 }
 0x8be   : > { %v1270_v32 = vmul.f32 %v2083_v7, %v1269_v28 }
 0x8bf   : > { %1329 = vmatpush.msrb.mxu2 %v1300_v15  ;;  %1349 = vmatpush.msrb.mxu3 %v1301_v18 }
 0x8c1   : > { %1350 = vmatpush.msrb.mxu3 %v1291_v19 }
 0x8c3   : > { %v1273_v21 = vpop.permute.xlu0 %1272  ;;  %1351 = vmatpush.msrb.mxu3 %v1709_v60  ;;  %v1283_v22 = vpop.permute.xlu1 %1282 }
 0x8c4   : > { %v1286_v23 = vsel %vm412_vm8, %v1283_v22, %v1285_v4  ;;  %v1279_v26 = vsel %vm401_vm9, 0.0, %v1273_v21 }
 0x8c5   : > { %v1290_v25 = vmul.f32 %v2083_v7, %v1286_v23  ;;  %v1280_v30 = vmul.f32 %v2081_v6, %v1279_v26 }
 0x8c7   : > { %1330 = vmatpush.msrb.mxu2 %v1290_v25 }
 0x8c9   : > { %1331 = vmatpush.msrb.mxu2 %v1707_v56 }
 0x8cb   : > { %v1265_v33 = vpop.permute.xlu0 %1264  ;;  %1332 = vmatpush.msrb.mxu2 %v1280_v30  ;;  %v1275_v34 = vpop.permute.xlu1 %1274 }
 0x8cc   : > { %v1266_v35 = vsel %vm390_vm10, %v1263_v24, %v1265_v33  ;;  %v1276_v36 = vsel %vm401_vm9, %v1273_v21, %v1275_v34 }
 0x8cd   : > { %v1281_v38 = vmul.f32 %v2085_v8, %v1276_v36  ;;  %1333 = vmatpush.msrb.mxu2 %v1270_v32  ;;  %v1271_v40 = vmul.f32 %v2087_v9, %v1266_v35  ;;  %v1247_v9 = vpop.permute.xlu2 %1246 }
 0x8cf   : > { %1352 = vmatpush.msrb.mxu3 %v1281_v38 }
 0x8d1   : > { %1353 = vmatpush.msrb.mxu3 %v1271_v40 }
 0x8d3   : > { %v1255_v7 = vpop.permute.xlu0 %1254  ;;  %v1245_v42 = vpop.permute.xlu1 %1244 }
 0x8d4   : > { %v1251_v43 = vsel %vm370_vm13, 0.0, %v1245_v42  ;;  %1555 = vmatpush.msk.msrb.mxu2 %vm2158_vm12, %v1255_v7  ;;  %v1248_v46 = vsel %vm370_vm13, %v1245_v42, %v1247_v9 }
 0x8d5   : > { %v1252_v44 = vmul.f32 %v2081_v6, %v1251_v43  ;;  %v1253_v49 = vmul.f32 %v2085_v8, %v1248_v46 }
 0x8d7   : > { %1335 = vmatpush.msrb.mxu2 %v1252_v44 }
 0x8d8   : > { %1556 = vmatmul.msk.f32.vlgmr.msrb.gmra.mxu2 %vm457_vm14, %v1715_v45 }
 0x8db   : > { %v1257_v47 = vpop.permute.xlu1 %1256 }
 0x8dc   : > { %v1258_v48 = vsel %vm381_vm11, %v1255_v7, %v1257_v47 }
 0x8dd   : > { %1354 = vmatpush.msrb.mxu3 %v1258_v48 }
 0x8df   : > { %1355 = vmatpush.msrb.mxu3 %v1253_v49 }
 0x8e0   : > { %1558 = vmatmul.msk.f32.vlgmr.msrb.gmra.mxu3 %vm457_vm14, %v1715_v45 }
 0x95b   : > { %v1337_v6 = vpop.f32.mrf.mxu2 }
 0x95c   : > { %v1338_v54 = vadd.f32 %v1337_v6, %v2244_v59 }
 0x95e   : > { %v1377_v51 = vadd.f32 %v2481_v53, %v1338_v54 }
 0x960   : > { %v1380_v52 = vmul.f32 %v1379_v50, %v1377_v51 }
 0x962   : > { %v1382_v56 = vadd.f32 %v2477_v57, %v1380_v52 }
 0x963   : > { %v1357_v58 = vpop.f32.mrf.mxu3 }
 0x964   : > { %1384 = vst [vmem:[#allocation2] sm:$0xff] %v1382_v56  ;;  %v1358_v60 = vadd.f32 %v1357_v58, %v2244_v59 }
 0x966   : > { %v1378_v8 = vadd.f32 %v2489_v16, %v1358_v60 }
 0x968   : > { %v1381_v0 = vmul.f32 %v1379_v50, %v1378_v8 }
 0x96a   : > { %v1383_v55 = vadd.f32 %v2486_v62, %v1381_v0 }
 0x96c   : > { %1385 = vst [vmem:[#allocation2 + $0x8] sm:$0xff] %v1383_v55 }
 0x96d PF: > { %s2693_s19 = sld [smem:[#allocation13_spill]]  ;;  %s1560_s15 = sshll.u32 %s1871_s27, 1 }
 0x96e   : > { %s1402_s6 = sshll.u32 %s297_s10, 4  ;;  %s2695_s0 = sld [smem:[#allocation22_spill]]  ;;  %s1403_s6 = int_to_ptr.vmem [resolvable:$true] %s1402_s6 }
 0x96f   : > { %s1387_s13 = scalar_lea.sflag [#allocation5], %s295_s4 }
 0x973   : > { %s1561_s16 = sshll.u32 %s2693_s19, 4 }
 0x974   : > { %s1398_s21 = sadd.s32 %s1561_s16, %s1560_s15  ;;  %s1781_s10 = scalar_lea.hbm %s2695_s0, 128 }
 0x975   : > { %s1562_s28 = sshll.u32 %s1398_s21, 2 }
 0x976   : > { %s1400_s11 = scalar_lea.hbm %s2695_s0, %s1562_s28 }
 0x977   : > { %s1404_s12 = sshll.u32 %s1400_s11, 4  ;;  %s1405_s12 = int_to_ptr.hbm [resolvable:$true] %s1404_s12 }
 0x978   : > { %s1775_s18 = sshra.s32 %s1405_s12, 4  ;;  %s1776_s18 = int_to_ptr.hbm [resolvable:$true] %s1775_s18 }
 0x979   : > { %s1777_s1 = scalar_lea.hbm %s1776_s18, 8  ;;  %p1782_p4 = scmp.lt.s32.totalorder %s1776_s18, %s2695_s0 }
 0x97a   : > { %p1778_p11 = scmp.ne.s32.totalorder %s1776_s18, %s1777_s1  ;;  %p1783_p5 = scmp.lt.s32.totalorder %s1781_s10, %s1777_s1 }
 0x97c   : > { %p1779_p0 = pnand %p1778_p11, %p2007_p7  ;;  %p1784_p6 = por %p1783_p5, %p1782_p4 }
 0x97e   : > { %p1780_p2 = pneg %p1779_p0 }
 0x980   : > { %p1785_p8 = pnand %p1784_p6, %p1780_p2 }
 0x982   : > { %1788 = shalt.err (!%p1785_p8)
}
 0x983   : > { %1574 = dma.vmem_to_hbm [thread:$0]  (%p2007_p7), %s1403_s6, 128, %s1405_s12, %s1387_s13  }
 0x984 PF: > { %s2696_s4 = sld [smem:[#allocation12_spill]]  ;;  %p1591_p10 = scmp.ge.s32.totalorder %s1887_s7, 2 }
 0x986   : > { %p1585_p12 = pnand %p1591_p10, %p2012_p9 }
 0x988   : > { %p1586_p13 = pneg %p1585_p12 }
 0x98a   : > { %s1416_s21 = sand.u32 1, %s2696_s4  }
 0x98b   : > { %s1417_s28 = scalar_lea.sflag [#allocation5], %s1416_s21 }
 0x98c   : > { %1842 = dma.done.wait (%p1586_p13), %s1417_s28, 128  }
 0x98d   : > { %1844 = vsyncadd (%p1586_p13), %s1417_s28, 4294967168  ;;  %s23_s7 = sadd.s32 1, %s1887_s7   ;;  %s2698_s27 = sld [smem:[#allocation14_spill]] }
 0x98e   : > { %p20_p1 = scmp.ge.s32.totalorder %s23_s7, 18   ;;  %s2699_s1 = sld [smem:[#allocation17_spill]] }
 0x98f   : > { %s2700_s8 = smov %s2715_s24  ;;  %s2701_s21 = smov %s1851_s22 }
 0x990   : > { %s2702_s22 = smov %s1855_s23  ;;  %s2703_s23 = smov %s2056_s29 }
 0x991   : > { %s2704_s24 = smov %s1863_s25  ;;  %s2705_s25 = smov %s1867_s26 }
 0x992   : > { %s2706_s26 = smov %s2051_s14  ;;  %s2707_s28 = smov %s1883_s30 }
 0x993   : > { %s2709_s30 = smov %s2700_s8  ;;  %22 = sbr.rel (!%p20_p1) target bundleno = 16 (0x10), region = 102 }
 0x994   : > { %s2708_s29 = smov %s2699_s1 }
 0x998   :  { %1423 = vsyncpa [#allocation4], 1 }
 0x999   :  { %1425 = vsyncpa [#allocation4 + $0x1], 1 }
 0x99a   :  { %1426 = vsyncpa [#allocation5], 1 }
 0x99b   :  { %1428 = vsyncpa [#allocation5 + $0x1], 1 }
 0x99c   :  { %1429 = vsyncpa [#allocation6], 1 }
 0x99d   :  { %1431 = vsyncpa [#allocation6 + $0x1], 1 }

</bundles_post_ra>
